<compile_context>
chip_gen: v5e
topology: v5e:2x2
jax: 0.10.0
libtpu: 0.0.40
codegen_flags: <defaults>
</compile_context>

<pallas_src>
import functools

import jax
import jax.numpy as jnp
from jax import lax
from jax.experimental import pallas as pl
from jax.experimental.pallas import tpu as pltpu

# ---------------- small synthetic config (consistent with the forward) -------
BATCH = 4
IMG_C, IMG_H, IMG_W = 3, 32, 32
PATCH = 16
N_PATCH = (IMG_H // PATCH) * (IMG_W // PATCH)   # 4
IMG_TOKENS = N_PATCH + 1                        # 5   (197 in the real model)
VISION_WIDTH = 128
TEXT_WIDTH = 128
EMBED_DIM = 128
VOCAB = 256
SEQ = 8                                         # 30 in the real model
NUM_HEADS = 4
HEAD_DIM = TEXT_WIDTH // NUM_HEADS
PAD_ID = 0
BOS_ID = 1

INV_TEMP_ATTN = 1.0 / 0.05                      # attention-distillation 1/temp

_VMEM = functools.partial(pl.BlockSpec, memory_space=pltpu.MemorySpace.VMEM)
_SMEM = functools.partial(pl.BlockSpec, memory_space=pltpu.MemorySpace.SMEM)


# ============================ Pallas kernels ==================================
def _linear_kernel(x_ref, w_ref, b_ref, o_ref):
    o_ref[...] = (jnp.dot(x_ref[...], w_ref[...],
                          preferred_element_type=jnp.float32) + b_ref[...])


def _linear_normalize_kernel(x_ref, w_ref, b_ref, o_ref):
    y = jnp.dot(x_ref[...], w_ref[...],
                preferred_element_type=jnp.float32) + b_ref[...]
    ss = jnp.sum(y * y, axis=-1, keepdims=True)
    # F.normalize(dim=-1): y / max(||y||, 1e-12)  ==  y * rsqrt(max(||y||^2, 1e-24))
    o_ref[...] = y * lax.rsqrt(jnp.maximum(ss, 1e-24))


def pallas_linear(x, w_t, b, normalize=False, row_tile=None):
    """y = x @ w_t + b on the MXU (bf16 operands, f32 accumulation).

    When `row_tile` evenly splits the rows into >1 blocks, the matmul gets a
    1-D "parallel" grid so v7x's two TensorCores can split it (a cheap serial
    loop on v5e/v6e, harmless at these sizes).
    """
    m, k = x.shape
    n = w_t.shape[1]
    kernel = _linear_normalize_kernel if normalize else _linear_kernel
    xb = x.astype(jnp.bfloat16)                 # halve operand DMA bytes
    wb = w_t.astype(jnp.bfloat16)
    bb = b.reshape(1, -1).astype(jnp.float32)
    out_shape = jax.ShapeDtypeStruct((m, n), jnp.float32)
    if row_tile is None or row_tile % 8 or m % row_tile or m // row_tile < 2:
        return pl.pallas_call(
            kernel, out_shape=out_shape,
            in_specs=[_VMEM(), _VMEM(), _VMEM()],
            out_specs=_VMEM(),
        )(xb, wb, bb)
    return pl.pallas_call(
        kernel, out_shape=out_shape,
        grid=(m // row_tile,),
        in_specs=[pl.BlockSpec((row_tile, k), lambda i: (i, 0)),
                  pl.BlockSpec((k, n), lambda i: (0, 0)),
                  pl.BlockSpec((1, n), lambda i: (0, 0))],
        out_specs=pl.BlockSpec((row_tile, n), lambda i: (i, 0)),
        compiler_params=pltpu.CompilerParams(dimension_semantics=("parallel",)),
    )(xb, wb, bb)


# ---- fused feature-level losses (ITM + sigmoid-KL + 4 cosine distillations) --
def _feature_losses_kernel(tf_ref, if_ref, cls_s_ref, cls_t_ref,
                           ws_ref, bs_ref, wt_ref, bt_ref, sb_ref, o_ref):
    b2 = tf_ref.shape[0]
    b = b2 // 2                                          # student rows / teacher rows

    def cos_mean(x, y):
        d = jnp.sum(x * y, axis=-1, keepdims=True)
        nx2 = jnp.sum(x * x, axis=-1, keepdims=True)
        ny2 = jnp.sum(y * y, axis=-1, keepdims=True)
        cos = d * lax.rsqrt(jnp.maximum(nx2 * ny2, 1e-16))   # EUP rsqrt, no vdiv
        return jnp.mean(1.0 - cos)                       # CosineEmbeddingLoss, target=+1

    # -- sigmoid contrastive ITM + its KL distillation: ONE stacked (2B,2B) matmul
    scale = jnp.exp(sb_ref[0, 0])
    bias = sb_ref[0, 1]
    dn = (((1,), (1,)), ((), ()))                        # text_feat @ image_feat.T
    sim = lax.dot_general(tf_ref[...], if_ref[...], dn,
                          preferred_element_type=jnp.float32) * scale + bias
    row = lax.broadcasted_iota(jnp.int32, (b, b), 0)
    col = lax.broadcasted_iota(jnp.int32, (b, b), 1)
    labels = jnp.where(row == col, 1.0, -1.0)            # 2*eye(b) - ones(b)
    z = labels * sim[:b, :b]                             # student result
    zt = labels * sim[b:, b:]                            # teacher result
    log_sig_z = jax.nn.log_sigmoid(z)
    o_ref[0, 0] = -jnp.sum(log_sig_z) / b                # loss_itm
    # KLDivLoss(sum)(logsigmoid(labels*result_tea), sigmoid(labels*result))
    target = jax.nn.sigmoid(z)
    o_ref[0, 1] = jnp.sum(target * (log_sig_z - jax.nn.log_sigmoid(zt)))  # loss_ita_dist

    # -- cosine-embedding distillation losses
    tf = tf_ref[...]
    imf = if_ref[...]
    o_ref[0, 2] = cos_mean(imf[:b], imf[b:])             # loss_img_dist
    o_ref[0, 3] = cos_mean(tf[:b], tf[b:])               # loss_text_dist

    # text_proj of stacked [mm CLS; decoder CLS]: one 8-row MXU pass per model
    proj_s = jnp.dot(cls_s_ref[...], ws_ref[...],
                     preferred_element_type=jnp.float32) + bs_ref[...]
    proj_t = jnp.dot(cls_t_ref[...], wt_ref[...],
                     preferred_element_type=jnp.float32) + bt_ref[...]
    o_ref[0, 4] = cos_mean(proj_s[:b], proj_t[:b])       # loss_vl_dist
    o_ref[0, 5] = cos_mean(proj_s[b:], proj_t[b:])       # loss_vl_dec_dist
    o_ref[0, 6] = 0.0
    o_ref[0, 7] = 0.0


def pallas_feature_losses(tf_stack, if_stack, cls_s, cls_t, ws, bs, wt, bt,
                          scale_bias):
    return pl.pallas_call(
        _feature_losses_kernel,
        out_shape=jax.ShapeDtypeStruct((1, 8), jnp.float32),
        in_specs=[_VMEM()] * 8 + [_SMEM()],
        out_specs=_SMEM(),
    )(tf_stack, if_stack, cls_s, cls_t, ws, bs, wt, bt, scale_bias)


# ---- fused sequence-level losses (LM CE + logits KL + 3 attention KLs) -------
def _sequence_losses_kernel(ls_ref, lt_ref, lbl_ref, klm_ref,
                            ea_s_ref, ea_t_ref, xa_s_ref, xa_t_ref,
                            da_s_ref, da_t_ref, o_ref):
    logits_s = ls_ref[...]                               # (B*S, V)
    logits_t = lt_ref[...]
    lbl = lbl_ref[...]                                   # (B*S, 1) int32, -100 = ignore
    klm = klm_ref[...]                                   # (B*S, 1) f32, 1 on shifted steps
    r, v = logits_s.shape

    logp_s = jax.nn.log_softmax(logits_s, axis=-1)
    logp_t = jax.nn.log_softmax(logits_t, axis=-1)

    # --- shifted LM cross-entropy (ignore_index=-100) ---
    col = lax.broadcasted_iota(jnp.int32, (r, v), 1)
    onehot = (col == lbl).astype(jnp.float32)            # never matches -100
    valid = (lbl != -100).astype(jnp.float32)
    nll = -jnp.sum(logp_s * onehot, axis=-1, keepdims=True) * valid
    o_ref[0, 0] = jnp.sum(nll) / jnp.maximum(jnp.sum(valid), 1.0)
    # TODO(synk): BLIP's BertLMHeadModel uses label_smoothing=0.1; plain CE here.

    # --- logits KL distillation (temp = 1.0, mean over B*(S-1) rows) ---
    p_t = jnp.exp(logp_t)
    kl_rows = jnp.sum(p_t * (logp_t - logp_s), axis=-1, keepdims=True)
    o_ref[0, 1] = jnp.sum(kl_rows * klm) / jnp.maximum(jnp.sum(klm), 1.0)

    # --- attention KL distillations (temp = 0.05) ---
    # Inputs are transposed to (K, rows): the softmax axis sits on sublanes and
    # the B*H*S rows fill all 128 lanes (lane-dense, ~1 vreg per tensor).
    def attn_kl(s_r, t_r):
        s = s_r[...] * INV_TEMP_ATTN
        t = t_r[...] * INV_TEMP_ATTN
        s = s - jnp.max(s, axis=0, keepdims=True)
        t = t - jnp.max(t, axis=0, keepdims=True)
        ls_ = s - jnp.log(jnp.sum(jnp.exp(s), axis=0, keepdims=True))
        lt_ = t - jnp.log(jnp.sum(jnp.exp(t), axis=0, keepdims=True))
        pt = jnp.exp(lt_)
        return jnp.sum(pt * (lt_ - ls_)) / s_r.shape[1]

    o_ref[0, 2] = attn_kl(ea_s_ref, ea_t_ref)            # loss_Sattn
    o_ref[0, 3] = attn_kl(xa_s_ref, xa_t_ref)            # loss_Xattn
    o_ref[0, 4] = attn_kl(da_s_ref, da_t_ref)            # loss_DXattn
    o_ref[0, 5] = 0.0
    o_ref[0, 6] = 0.0
    o_ref[0, 7] = 0.0


def pallas_sequence_losses(logits_s, logits_t, labels, kl_mask,
                           ea_s, ea_t, xa_s, xa_t, da_s, da_t):
    return pl.pallas_call(
        _sequence_losses_kernel,
        out_shape=jax.ShapeDtypeStruct((1, 8), jnp.float32),
        in_specs=[_VMEM()] * 10,
        out_specs=_SMEM(),
    )(logits_s, logits_t, labels, kl_mask, ea_s, ea_t, xa_s, xa_t, da_s, da_t)


# ===================== deterministic parameter init ===========================
def _linear_params(key, d_in, d_out):
    return {"w_t": 0.02 * jax.random.normal(key, (d_in, d_out), jnp.float32),
            "b": jnp.zeros((d_out,), jnp.float32)}


def _attn_layer_params(key, d_txt, d_img):
    ks = jax.random.split(key, 8)
    s = 0.02
    return {
        "wq": s * jax.random.normal(ks[0], (d_txt, d_txt), jnp.float32),
        "wk": s * jax.random.normal(ks[1], (d_txt, d_txt), jnp.float32),
        "wv": s * jax.random.normal(ks[2], (d_txt, d_txt), jnp.float32),
        "wo": s * jax.random.normal(ks[3], (d_txt, d_txt), jnp.float32),
        "cq": s * jax.random.normal(ks[4], (d_txt, d_txt), jnp.float32),
        "ck": s * jax.random.normal(ks[5], (d_img, d_txt), jnp.float32),
        "cv": s * jax.random.normal(ks[6], (d_img, d_txt), jnp.float32),
        "co": s * jax.random.normal(ks[7], (d_txt, d_txt), jnp.float32),
    }


def init_model_params(key):
    ks = jax.random.split(key, 12)
    return {
        "patch": _linear_params(ks[0], IMG_C * PATCH * PATCH, VISION_WIDTH),
        "cls": 0.02 * jax.random.normal(ks[1], (1, 1, VISION_WIDTH), jnp.float32),
        "pos_img": 0.02 * jax.random.normal(ks[2], (1, IMG_TOKENS, VISION_WIDTH), jnp.float32),
        "tok_emb": 0.02 * jax.random.normal(ks[3], (VOCAB, TEXT_WIDTH), jnp.float32),
        "pos_txt": 0.02 * jax.random.normal(ks[4], (1, SEQ, TEXT_WIDTH), jnp.float32),
        "enc": _attn_layer_params(ks[5], TEXT_WIDTH, VISION_WIDTH),
        "dec": _attn_layer_params(ks[6], TEXT_WIDTH, VISION_WIDTH),
        "vision_proj": _linear_params(ks[7], VISION_WIDTH, EMBED_DIM),
        "text_proj": _linear_params(ks[8], TEXT_WIDTH, EMBED_DIM),
        "lm_head": _linear_params(ks[9], TEXT_WIDTH, VOCAB),
        "logit_scale": jax.random.normal(ks[10], (), jnp.float32),
        "logit_bias": jax.random.normal(ks[11], (), jnp.float32),
    }


# ===================== stand-in encoders (plain JAX glue) =====================
def visual_encoder(p, image):
    # layout: `image` is NCHW (B, C, H, W) exactly like the PyTorch module. The
    # stride-PATCH Conv2d patch embedding is lowered to one Pallas MXU matmul:
    # NCHW is rearranged to (B*num_patches, C*P*P) with (C, ph, pw) ordering,
    # i.e. the same flattening order as a torch Conv2d weight (O, C, kh, kw).
    b, c, h, w = image.shape
    nh, nw = h // PATCH, w // PATCH
    patches = image.reshape(b, c, nh, PATCH, nw, PATCH)
    patches = patches.transpose(0, 2, 4, 1, 3, 5).reshape(b * nh * nw, c * PATCH * PATCH)
    emb = pallas_linear(patches, p["patch"]["w_t"], p["patch"]["b"], row_tile=8)
    emb = emb.reshape(b, nh * nw, VISION_WIDTH)
    cls = jnp.broadcast_to(p["cls"], (b, 1, VISION_WIDTH))
    x = jnp.concatenate([cls, emb], axis=1) + p["pos_img"]
    # TODO(synk): full ViT transformer stack (create_vit + DeiT checkpoint) not
    # reimplemented; patch-embed + CLS/pos stand-in only.
    return x


def _split_heads(x):
    b, s, d = x.shape
    return x.reshape(b, s, NUM_HEADS, d // NUM_HEADS).transpose(0, 2, 1, 3)


def _merge_heads(x):
    b, h, s, dh = x.shape
    return x.transpose(0, 2, 1, 3).reshape(b, s, h * dh)


def standin_bert(p, layer, input_ids, attention_mask, image_embeds=None, causal=False):
    # TODO(synk): HuggingFace BertModel / BertLMHeadModel are external pretrained
    # modules; replaced by a single deterministic attention layer that produces
    # the hidden states / attentions / cross-attentions the losses consume.
    b, s = input_ids.shape
    hid = p["tok_emb"][input_ids] + p["pos_txt"]
    q = _split_heads(hid @ layer["wq"])
    k = _split_heads(hid @ layer["wk"])
    v = _split_heads(hid @ layer["wv"])
    scores = jnp.einsum("bhqd,bhkd->bhqk", q, k) / jnp.sqrt(jnp.float32(HEAD_DIM))
    mask = (1.0 - attention_mask[:, None, None, :].astype(jnp.float32)) * -1e9
    if causal:
        causal_mask = jnp.tril(jnp.ones((s, s), jnp.float32))
        mask = mask + (1.0 - causal_mask)[None, None, :, :] * -1e9
    attn = jax.nn.softmax(scores + mask, axis=-1)            # (B, H, S, S)
    hid = hid + _merge_heads(jnp.einsum("bhqk,bhkd->bhqd", attn, v)) @ layer["wo"]
    cross_attn = None
    if image_embeds is not None:
        qc = _split_heads(hid @ layer["cq"])
        kc = _split_heads(image_embeds @ layer["ck"])
        vc = _split_heads(image_embeds @ layer["cv"])
        cscores = jnp.einsum("bhqd,bhkd->bhqk", qc, kc) / jnp.sqrt(jnp.float32(HEAD_DIM))
        cross_attn = jax.nn.softmax(cscores, axis=-1)        # image_atts are all ones
        hid = hid + _merge_heads(jnp.einsum("bhqk,bhkd->bhqd", cross_attn, vc)) @ layer["co"]
    return hid, attn, cross_attn


def model_features(p, image, input_ids, enc_input_ids, dec_input_ids, attention_mask):
    image_embeds = visual_encoder(p, image)
    image_feat = pallas_linear(image_embeds[:, 0, :], p["vision_proj"]["w_t"],
                               p["vision_proj"]["b"], normalize=True)
    text_hidden, _, _ = standin_bert(p, p["enc"], input_ids, attention_mask)
    text_feat = pallas_linear(text_hidden[:, 0, :], p["text_proj"]["w_t"],
                              p["text_proj"]["b"], normalize=True)
    mm_hidden, enc_attn, enc_xattn = standin_bert(
        p, p["enc"], enc_input_ids, attention_mask, image_embeds=image_embeds)
    dec_hidden, dec_attn, _ = standin_bert(
        p, p["dec"], dec_input_ids, attention_mask, image_embeds=image_embeds, causal=True)
    b, s, d = dec_hidden.shape
    # LM head: full (B*S, V) logits kept 2-D; shifting/masking happens in the
    # fused loss kernel (no sliced copy of the logits written back to HBM).
    logits2d = pallas_linear(dec_hidden.reshape(b * s, d), p["lm_head"]["w_t"],
                             p["lm_head"]["b"], row_tile=16)
    return dict(image_feat=image_feat, text_feat=text_feat, mm_hidden=mm_hidden,
                enc_attn=enc_attn, enc_xattn=enc_xattn, dec_hidden=dec_hidden,
                dec_attn=dec_attn, logits2d=logits2d)


# ============================ DLIP forward ====================================
@jax.jit
def dlip_pretrain_sigmoid_forward(params_s, params_t, image, input_ids, attention_mask):
    enc_input_ids = input_ids.at[:, 0].set(BOS_ID)
    dec_input_ids = input_ids.at[:, 0].set(BOS_ID)
    dec_targets = jnp.where(dec_input_ids == PAD_ID, -100, dec_input_ids).astype(jnp.int32)

    fs = model_features(params_s, image, input_ids, enc_input_ids, dec_input_ids, attention_mask)
    ft = model_features(params_t, image, input_ids, enc_input_ids, dec_input_ids, attention_mask)

    # ------------- fused feature-level losses: ONE pallas_call ---------------
    # Stack student/teacher rows -> 8-sublane-aligned operands, single MXU pass.
    tf_stack = jnp.concatenate([fs["text_feat"], ft["text_feat"]], axis=0)     # (2B, D)
    if_stack = jnp.concatenate([fs["image_feat"], ft["image_feat"]], axis=0)   # (2B, D)
    cls_s = jnp.concatenate([fs["mm_hidden"][:, 0, :], fs["dec_hidden"][:, 0, :]],
                            axis=0).astype(jnp.bfloat16)                       # (2B, D)
    cls_t = jnp.concatenate([ft["mm_hidden"][:, 0, :], ft["dec_hidden"][:, 0, :]],
                            axis=0).astype(jnp.bfloat16)
    scale_bias = jnp.stack([params_s["logit_scale"], params_s["logit_bias"]]).reshape(1, 2)
    feat = pallas_feature_losses(
        tf_stack, if_stack, cls_s, cls_t,
        params_s["text_proj"]["w_t"].astype(jnp.bfloat16),
        params_s["text_proj"]["b"].reshape(1, -1),
        params_t["text_proj"]["w_t"].astype(jnp.bfloat16),
        params_t["text_proj"]["b"].reshape(1, -1),
        scale_bias)
    loss_itm, loss_ita_dist = feat[0, 0], feat[0, 1]
    loss_img_dist, loss_text_dist = feat[0, 2], feat[0, 3]
    loss_vl_dist, loss_vl_dec_dist = feat[0, 4], feat[0, 5]

    # ------------- fused sequence-level losses: ONE pallas_call --------------
    b, s = input_ids.shape
    # shifted labels: position t predicts token t+1; last position ignored (-100)
    shifted_labels = jnp.concatenate(
        [dec_targets[:, 1:], jnp.full((b, 1), -100, jnp.int32)], axis=1).reshape(-1, 1)
    # mask selecting the B*(S-1) shifted rows for the logits-KL (pad-agnostic)
    kl_mask = jnp.tile((jnp.arange(s) < s - 1).astype(jnp.float32), (b,)).reshape(-1, 1)

    def t2d(a):  # (..., K) -> (K, rows): softmax axis on sublanes, rows on 128 lanes
        return a.reshape(-1, a.shape[-1]).T

    seq = pallas_sequence_losses(
        fs["logits2d"], ft["logits2d"], shifted_labels, kl_mask,
        t2d(fs["enc_attn"]), t2d(ft["enc_attn"]),
        t2d(fs["enc_xattn"]), t2d(ft["enc_xattn"]),
        t2d(fs["dec_attn"]), t2d(ft["dec_attn"]))
    loss_lm, loss_kl = seq[0, 0], seq[0, 1]
    loss_sattn, loss_xattn, loss_dxattn = seq[0, 2], seq[0, 3], seq[0, 4]

    loss_dist = (loss_img_dist + loss_text_dist + loss_vl_dist + loss_vl_dec_dist
                 + loss_ita_dist + loss_kl + loss_sattn + loss_xattn + loss_dxattn)
    return jnp.zeros((), jnp.int32), loss_itm, loss_lm, loss_dist


# ================================ main ========================================
if __name__ == "__main__":
    key = jax.random.PRNGKey(0)
    k_img, k_ids, k_s, k_t = jax.random.split(key, 4)

    image = jax.random.normal(k_img, (BATCH, IMG_C, IMG_H, IMG_W), jnp.float32)  # NCHW
    input_ids = jax.random.randint(k_ids, (BATCH, SEQ), 5, VOCAB, dtype=jnp.int32)
    input_ids = input_ids.at[:, 0].set(2)                  # [CLS]-like tokenizer token
    input_ids = input_ids.at[:2, SEQ - 2:].set(PAD_ID)     # some padding -> exercises masks
    attention_mask = (input_ids != PAD_ID).astype(jnp.int32)

    params_student = init_model_params(k_s)
    params_teacher = init_model_params(k_t)                # frozen teacher stand-in

    outs = dlip_pretrain_sigmoid_forward(params_student, params_teacher,
                                         image, input_ids, attention_mask)
    outs = jax.block_until_ready(outs)
    _zero, loss_itm, loss_lm, loss_dist = outs
    assert bool(jnp.isfinite(loss_itm)) and bool(jnp.isfinite(loss_lm)) and bool(jnp.isfinite(loss_dist))
    print("KERNEL_OK")
</pallas_src>

<mosaic_0001>
module attributes {stable_mosaic.version = 11 : i64} {
  func.func @_linear_normalize_kernel(%arg0: memref<4x128xbf16, #tpu.memory_space<vmem>>, %arg1: memref<128x128xbf16, #tpu.memory_space<vmem>>, %arg2: memref<1x128xf32, #tpu.memory_space<vmem>>, %arg3: memref<4x128xf32, #tpu.memory_space<vmem>>) attributes {dimension_semantics = [], scalar_prefetch = 0 : i64, scratch_operands = 0 : i64, tpu.core_type = #tpu.core_type<tc>} {
    %c0 = arith.constant 0 : index
    %c0_0 = arith.constant 0 : index
    %0 = vector.load %arg0[%c0, %c0_0] : memref<4x128xbf16, #tpu.memory_space<vmem>>, vector<4x128xbf16>
    %c0_1 = arith.constant 0 : index
    %c0_2 = arith.constant 0 : index
    %1 = vector.load %arg1[%c0_1, %c0_2] : memref<128x128xbf16, #tpu.memory_space<vmem>>, vector<128x128xbf16>
    %cst = arith.constant dense<0.000000e+00> : vector<4x128xf32>
    %2 = tpu.matmul %0, %1, %cst {dimension_numbers = #tpu.dot_dimension_numbers<[1], [0], [0], [1], [0, 0, 1, 1], [], []>} : vector<4x128xbf16>, vector<128x128xbf16>, vector<4x128xf32> -> vector<4x128xf32>
    %c0_3 = arith.constant 0 : index
    %c0_4 = arith.constant 0 : index
    %3 = vector.load %arg2[%c0_3, %c0_4] : memref<1x128xf32, #tpu.memory_space<vmem>>, vector<1x128xf32>
    %4 = vector.broadcast %3 : vector<1x128xf32> to vector<4x128xf32>
    %5 = arith.addf %2, %4 : vector<4x128xf32>
    %6 = arith.mulf %5, %5 : vector<4x128xf32>
    %cst_5 = arith.constant dense<0.000000e+00> : vector<4xf32>
    %7 = vector.multi_reduction <add>, %6, %cst_5 [1] : vector<4x128xf32> to vector<4xf32>
    %8 = vector.shape_cast %7 : vector<4xf32> to vector<4x1xf32>
    %cst_6 = arith.constant 1.000000e-24 : f32
    %9 = vector.broadcast %cst_6 : f32 to vector<4x1xf32>
    %10 = arith.maximumf %8, %9 : vector<4x1xf32>
    %11 = math.rsqrt %10 : vector<4x1xf32>
    %12 = vector.broadcast %11 : vector<4x1xf32> to vector<4x128xf32>
    %13 = arith.mulf %5, %12 : vector<4x128xf32>
    %c0_7 = arith.constant 0 : index
    %c0_8 = arith.constant 0 : index
    %14 = vector.load %arg3[%c0_7, %c0_8] : memref<4x128xf32, #tpu.memory_space<vmem>>, vector<4x128xf32>
    tpu.vector_store %arg3[%c0_7, %c0_8], %13 {strides = array<i32>} : memref<4x128xf32, #tpu.memory_space<vmem>>, vector<4x128xf32>,
    return
  }
}

module attributes {stable_mosaic.version = 11 : i64} {
  func.func @_linear_kernel(%arg0: i32, %arg1: memref<8x768xbf16, #tpu.memory_space<vmem>>, %arg2: memref<768x128xbf16, #tpu.memory_space<vmem>>, %arg3: memref<1x128xf32, #tpu.memory_space<vmem>>, %arg4: memref<8x128xf32, #tpu.memory_space<vmem>>) attributes {dimension_semantics = [#tpu.dimension_semantics<parallel>], iteration_bounds = array<i64: 2>, scalar_prefetch = 0 : i64, scratch_operands = 0 : i64, tpu.core_type = #tpu.core_type<tc>, window_params = [{transform_indices = @transform_0, window_bounds = array<i64: 8, 768>}, {pipeline_mode = #tpu.pipeline_mode<synchronous>, transform_indices = @transform_1, window_bounds = array<i64: 768, 128>}, {pipeline_mode = #tpu.pipeline_mode<synchronous>, transform_indices = @transform_2, window_bounds = array<i64: 1, 128>}, {transform_indices = @transform_3, window_bounds = array<i64: 8, 128>}]} {
    %c0 = arith.constant 0 : index
    %c0_0 = arith.constant 0 : index
    %0 = vector.load %arg1[%c0, %c0_0] : memref<8x768xbf16, #tpu.memory_space<vmem>>, vector<8x768xbf16>
    %c0_1 = arith.constant 0 : index
    %c0_2 = arith.constant 0 : index
    %1 = vector.load %arg2[%c0_1, %c0_2] : memref<768x128xbf16, #tpu.memory_space<vmem>>, vector<768x128xbf16>
    %cst = arith.constant dense<0.000000e+00> : vector<8x128xf32>
    %2 = tpu.matmul %0, %1, %cst {dimension_numbers = #tpu.dot_dimension_numbers<[1], [0], [0], [1], [0, 0, 1, 1], [], []>} : vector<8x768xbf16>, vector<768x128xbf16>, vector<8x128xf32> -> vector<8x128xf32>
    %c0_3 = arith.constant 0 : index
    %c0_4 = arith.constant 0 : index
    %3 = vector.load %arg3[%c0_3, %c0_4] : memref<1x128xf32, #tpu.memory_space<vmem>>, vector<1x128xf32>
    %4 = vector.broadcast %3 : vector<1x128xf32> to vector<8x128xf32>
    %5 = arith.addf %2, %4 : vector<8x128xf32>
    %c0_5 = arith.constant 0 : index
    %c0_6 = arith.constant 0 : index
    %6 = vector.load %arg4[%c0_5, %c0_6] : memref<8x128xf32, #tpu.memory_space<vmem>>, vector<8x128xf32>
    tpu.vector_store %arg4[%c0_5, %c0_6], %5 {strides = array<i32>} : memref<8x128xf32, #tpu.memory_space<vmem>>, vector<8x128xf32>,
    return
  }
  func.func @transform_0(%arg0: i32) -> (i32, i32) {
    %c0_i32 = arith.constant 0 : i32
    %c0_i32_0 = arith.constant 0 : i32
    return %arg0, %c0_i32 : i32, i32
  }
  func.func @transform_1(%arg0: i32) -> (i32, i32) {
    %c0_i32 = arith.constant 0 : i32
    %c0_i32_0 = arith.constant 0 : i32
    %c0_i32_1 = arith.constant 0 : i32
    return %c0_i32, %c0_i32_0 : i32, i32
  }
  func.func @transform_2(%arg0: i32) -> (i32, i32) {
    %c0_i32 = arith.constant 0 : i32
    %c0_i32_0 = arith.constant 0 : i32
    %c0_i32_1 = arith.constant 0 : i32
    return %c0_i32, %c0_i32_0 : i32, i32
  }
  func.func @transform_3(%arg0: i32) -> (i32, i32) {
    %c0_i32 = arith.constant 0 : i32
    %c0_i32_0 = arith.constant 0 : i32
    return %arg0, %c0_i32 : i32, i32
  }
}

module attributes {stable_mosaic.version = 11 : i64} {
  func.func @_feature_losses_kernel(%arg0: memref<8x128xf32, #tpu.memory_space<vmem>>, %arg1: memref<8x128xf32, #tpu.memory_space<vmem>>, %arg2: memref<8x128xbf16, #tpu.memory_space<vmem>>, %arg3: memref<8x128xbf16, #tpu.memory_space<vmem>>, %arg4: memref<128x128xbf16, #tpu.memory_space<vmem>>, %arg5: memref<1x128xf32, #tpu.memory_space<vmem>>, %arg6: memref<128x128xbf16, #tpu.memory_space<vmem>>, %arg7: memref<1x128xf32, #tpu.memory_space<vmem>>, %arg8: memref<1x2xf32, #tpu.memory_space<smem>>, %arg9: memref<1x8xf32, #tpu.memory_space<smem>>) attributes {dimension_semantics = [], scalar_prefetch = 0 : i64, scratch_operands = 0 : i64, tpu.core_type = #tpu.core_type<tc>} {
    %c0 = arith.constant 0 : index
    %c0_0 = arith.constant 0 : index
    %0 = memref.load %arg8[%c0, %c0_0] : memref<1x2xf32, #tpu.memory_space<smem>>
    %1 = math.exp %0 : f32
    %c0_1 = arith.constant 0 : index
    %c1 = arith.constant 1 : index
    %2 = memref.load %arg8[%c0_1, %c1] : memref<1x2xf32, #tpu.memory_space<smem>>
    %c0_2 = arith.constant 0 : index
    %c0_3 = arith.constant 0 : index
    %3 = vector.load %arg0[%c0_2, %c0_3] : memref<8x128xf32, #tpu.memory_space<vmem>>, vector<8x128xf32>
    %c0_4 = arith.constant 0 : index
    %c0_5 = arith.constant 0 : index
    %4 = vector.load %arg1[%c0_4, %c0_5] : memref<8x128xf32, #tpu.memory_space<vmem>>, vector<8x128xf32>
    %cst = arith.constant dense<0.000000e+00> : vector<8x8xf32>
    %5 = tpu.matmul %3, %4, %cst {dimension_numbers = #tpu.dot_dimension_numbers<[1], [1], [0], [0], [0, 0, 1, 0], [], []>} : vector<8x128xf32>, vector<8x128xf32>, vector<8x8xf32> -> vector<8x8xf32>
    %6 = vector.broadcast %1 : f32 to vector<8x8xf32>
    %7 = arith.mulf %5, %6 : vector<8x8xf32>
    %8 = vector.broadcast %2 : f32 to vector<8x8xf32>
    %9 = arith.addf %7, %8 : vector<8x8xf32>
    %10 = tpu.iota {dimensions = array<i32: 0>} : vector<4x4xi32>
    %11 = tpu.iota {dimensions = array<i32: 1>} : vector<4x4xi32>
    %12 = arith.cmpi eq, %10, %11 : vector<4x4xi32>
    %cst_6 = arith.constant 1.000000e+00 : f32
    %cst_7 = arith.constant -1.000000e+00 : f32
    %13 = vector.broadcast %cst_6 : f32 to vector<4x4xf32>
    %14 = vector.broadcast %cst_7 : f32 to vector<4x4xf32>
    %15 = arith.select %12, %13, %14 : vector<4x4xi1>, vector<4x4xf32>
    %16 = vector.extract_strided_slice %9 {offsets = [0, 0], sizes = [4, 4], strides = [1, 1]} : vector<8x8xf32> to vector<4x4xf32>
    %17 = arith.mulf %15, %16 : vector<4x4xf32>
    %18 = vector.extract_strided_slice %9 {offsets = [4, 4], sizes = [4, 4], strides = [1, 1]} : vector<8x8xf32> to vector<4x4xf32>
    %19 = arith.mulf %15, %18 : vector<4x4xf32>
    %cst_8 = arith.constant 0.000000e+00 : f32
    %20 = vector.broadcast %cst_8 : f32 to vector<4x4xf32>
    %21 = arith.subf %20, %17 : vector<4x4xf32>
    %cst_9 = arith.constant 0.000000e+00 : f32
    %22 = vector.broadcast %cst_9 : f32 to vector<4x4xf32>
    %23 = arith.maximumf %21, %22 : vector<4x4xf32>
    %24 = vector.broadcast %cst_9 : f32 to vector<4x4xf32>
    %25 = arith.subf %21, %24 : vector<4x4xf32>
    %26 = arith.cmpf one, %25, %25 : vector<4x4xf32>
    %27 = vector.broadcast %cst_9 : f32 to vector<4x4xf32>
    %28 = arith.addf %21, %27 : vector<4x4xf32>
    %29 = math.absf %25 : vector<4x4xf32>
    %cst_10 = arith.constant 0.000000e+00 : f32
    %30 = vector.broadcast %cst_10 : f32 to vector<4x4xf32>
    %31 = arith.subf %30, %29 : vector<4x4xf32>
    %32 = math.exp %31 : vector<4x4xf32>
    %33 = math.log1p %32 : vector<4x4xf32>
    %34 = arith.addf %23, %33 : vector<4x4xf32>
    %35 = arith.select %26, %28, %34 : vector<4x4xi1>, vector<4x4xf32>
    %cst_11 = arith.constant 0.000000e+00 : f32
    %36 = vector.broadcast %cst_11 : f32 to vector<4x4xf32>
    %37 = arith.subf %36, %35 : vector<4x4xf32>
    %38 = vector.shape_cast %37 : vector<4x4xf32> to vector<1x4x4xf32>
    %cst_12 = arith.constant dense<0.000000e+00> : vector<1xf32>
    %39 = vector.multi_reduction <add>, %38, %cst_12 [1, 2] : vector<1x4x4xf32> to vector<1xf32>
    %40 = vector.shape_cast %39 : vector<1xf32> to vector<1x1x1xf32>
    %41 = vector.extract %40[0, 0, 0] : f32 from vector<1x1x1xf32>
    %cst_13 = arith.constant 0.000000e+00 : f32
    %42 = arith.subf %cst_13, %41 : f32
    %cst_14 = arith.constant 4.000000e+00 : f32
    %43 = arith.divf %42, %cst_14 : f32
    %c0_15 = arith.constant 0 : index
    %c0_16 = arith.constant 0 : index
    %44 = memref.load %arg9[%c0_15, %c0_16] : memref<1x8xf32, #tpu.memory_space<smem>>
    memref.store %43, %arg9[%c0_15, %c0_16] : memref<1x8xf32, #tpu.memory_space<smem>>
    %45 = arith.negf %17 : vector<4x4xf32>
    %46 = math.exp %45 : vector<4x4xf32>
    %cst_17 = arith.constant 1.000000e+00 : f32
    %47 = vector.broadcast %cst_17 : f32 to vector<4x4xf32>
    %48 = arith.addf %47, %46 : vector<4x4xf32>
    %49 = arith.divf %47, %48 : vector<4x4xf32>
    %cst_18 = arith.constant 0.000000e+00 : f32
    %50 = vector.broadcast %cst_18 : f32 to vector<4x4xf32>
    %51 = arith.subf %50, %19 : vector<4x4xf32>
    %cst_19 = arith.constant 0.000000e+00 : f32
    %52 = vector.broadcast %cst_19 : f32 to vector<4x4xf32>
    %53 = arith.maximumf %51, %52 : vector<4x4xf32>
    %54 = vector.broadcast %cst_19 : f32 to vector<4x4xf32>
    %55 = arith.subf %51, %54 : vector<4x4xf32>
    %56 = arith.cmpf one, %55, %55 : vector<4x4xf32>
    %57 = vector.broadcast %cst_19 : f32 to vector<4x4xf32>
    %58 = arith.addf %51, %57 : vector<4x4xf32>
    %59 = math.absf %55 : vector<4x4xf32>
    %cst_20 = arith.constant 0.000000e+00 : f32
    %60 = vector.broadcast %cst_20 : f32 to vector<4x4xf32>
    %61 = arith.subf %60, %59 : vector<4x4xf32>
    %62 = math.exp %61 : vector<4x4xf32>
    %63 = math.log1p %62 : vector<4x4xf32>
    %64 = arith.addf %53, %63 : vector<4x4xf32>
    %65 = arith.select %56, %58, %64 : vector<4x4xi1>, vector<4x4xf32>
    %cst_21 = arith.constant 0.000000e+00 : f32
    %66 = vector.broadcast %cst_21 : f32 to vector<4x4xf32>
    %67 = arith.subf %66, %65 : vector<4x4xf32>
    %68 = arith.subf %37, %67 : vector<4x4xf32>
    %69 = arith.mulf %49, %68 : vector<4x4xf32>
    %70 = vector.shape_cast %69 : vector<4x4xf32> to vector<1x4x4xf32>
    %cst_22 = arith.constant dense<0.000000e+00> : vector<1xf32>
    %71 = vector.multi_reduction <add>, %70, %cst_22 [1, 2] : vector<1x4x4xf32> to vector<1xf32>
    %72 = vector.shape_cast %71 : vector<1xf32> to vector<1x1x1xf32>
    %73 = vector.extract %72[0, 0, 0] : f32 from vector<1x1x1xf32>
    %c0_23 = arith.constant 0 : index
    %c1_24 = arith.constant 1 : index
    %74 = memref.load %arg9[%c0_23, %c1_24] : memref<1x8xf32, #tpu.memory_space<smem>>
    memref.store %73, %arg9[%c0_23, %c1_24] : memref<1x8xf32, #tpu.memory_space<smem>>
    %c0_25 = arith.constant 0 : index
    %c0_26 = arith.constant 0 : index
    %75 = vector.load %arg0[%c0_25, %c0_26] : memref<8x128xf32, #tpu.memory_space<vmem>>, vector<8x128xf32>
    %c0_27 = arith.constant 0 : index
    %c0_28 = arith.constant 0 : index
    %76 = vector.load %arg1[%c0_27, %c0_28] : memref<8x128xf32, #tpu.memory_space<vmem>>, vector<8x128xf32>
    %77 = vector.extract_strided_slice %76 {offsets = [0, 0], sizes = [4, 128], strides = [1, 1]} : vector<8x128xf32> to vector<4x128xf32>
    %78 = vector.extract_strided_slice %76 {offsets = [4, 0], sizes = [4, 128], strides = [1, 1]} : vector<8x128xf32> to vector<4x128xf32>
    %79 = arith.mulf %77, %78 : vector<4x128xf32>
    %cst_29 = arith.constant dense<0.000000e+00> : vector<4xf32>
    %80 = vector.multi_reduction <add>, %79, %cst_29 [1] : vector<4x128xf32> to vector<4xf32>
    %81 = vector.shape_cast %80 : vector<4xf32> to vector<4x1xf32>
    %82 = arith.mulf %77, %77 : vector<4x128xf32>
    %cst_30 = arith.constant dense<0.000000e+00> : vector<4xf32>
    %83 = vector.multi_reduction <add>, %82, %cst_30 [1] : vector<4x128xf32> to vector<4xf32>
    %84 = vector.shape_cast %83 : vector<4xf32> to vector<4x1xf32>
    %85 = arith.mulf %78, %78 : vector<4x128xf32>
    %cst_31 = arith.constant dense<0.000000e+00> : vector<4xf32>
    %86 = vector.multi_reduction <add>, %85, %cst_31 [1] : vector<4x128xf32> to vector<4xf32>
    %87 = vector.shape_cast %86 : vector<4xf32> to vector<4x1xf32>
    %88 = arith.mulf %84, %87 : vector<4x1xf32>
    %cst_32 = arith.constant 1.000000e-16 : f32
    %89 = vector.broadcast %cst_32 : f32 to vector<4x1xf32>
    %90 = arith.maximumf %88, %89 : vector<4x1xf32>
    %91 = math.rsqrt %90 : vector<4x1xf32>
    %92 = arith.mulf %81, %91 : vector<4x1xf32>
    %cst_33 = arith.constant 1.000000e+00 : f32
    %93 = vector.broadcast %cst_33 : f32 to vector<4x1xf32>
    %94 = arith.subf %93, %92 : vector<4x1xf32>
    %95 = vector.shape_cast %94 : vector<4x1xf32> to vector<1x4x1xf32>
    %cst_34 = arith.constant dense<0.000000e+00> : vector<1xf32>
    %96 = vector.multi_reduction <add>, %95, %cst_34 [1, 2] : vector<1x4x1xf32> to vector<1xf32>
    %97 = vector.shape_cast %96 : vector<1xf32> to vector<1x1x1xf32>
    %98 = vector.extract %97[0, 0, 0] : f32 from vector<1x1x1xf32>
    %cst_35 = arith.constant 4.000000e+00 : f32
    %99 = arith.divf %98, %cst_35 : f32
    %c0_36 = arith.constant 0 : index
    %c2 = arith.constant 2 : index
    %100 = memref.load %arg9[%c0_36, %c2] : memref<1x8xf32, #tpu.memory_space<smem>>
    memref.store %99, %arg9[%c0_36, %c2] : memref<1x8xf32, #tpu.memory_space<smem>>
    %101 = vector.extract_strided_slice %75 {offsets = [0, 0], sizes = [4, 128], strides = [1, 1]} : vector<8x128xf32> to vector<4x128xf32>
    %102 = vector.extract_strided_slice %75 {offsets = [4, 0], sizes = [4, 128], strides = [1, 1]} : vector<8x128xf32> to vector<4x128xf32>
    %103 = arith.mulf %101, %102 : vector<4x128xf32>
    %cst_37 = arith.constant dense<0.000000e+00> : vector<4xf32>
    %104 = vector.multi_reduction <add>, %103, %cst_37 [1] : vector<4x128xf32> to vector<4xf32>
    %105 = vector.shape_cast %104 : vector<4xf32> to vector<4x1xf32>
    %106 = arith.mulf %101, %101 : vector<4x128xf32>
    %cst_38 = arith.constant dense<0.000000e+00> : vector<4xf32>
    %107 = vector.multi_reduction <add>, %106, %cst_38 [1] : vector<4x128xf32> to vector<4xf32>
    %108 = vector.shape_cast %107 : vector<4xf32> to vector<4x1xf32>
    %109 = arith.mulf %102, %102 : vector<4x128xf32>
    %cst_39 = arith.constant dense<0.000000e+00> : vector<4xf32>
    %110 = vector.multi_reduction <add>, %109, %cst_39 [1] : vector<4x128xf32> to vector<4xf32>
    %111 = vector.shape_cast %110 : vector<4xf32> to vector<4x1xf32>
    %112 = arith.mulf %108, %111 : vector<4x1xf32>
    %cst_40 = arith.constant 1.000000e-16 : f32
    %113 = vector.broadcast %cst_40 : f32 to vector<4x1xf32>
    %114 = arith.maximumf %112, %113 : vector<4x1xf32>
    %115 = math.rsqrt %114 : vector<4x1xf32>
    %116 = arith.mulf %105, %115 : vector<4x1xf32>
    %cst_41 = arith.constant 1.000000e+00 : f32
    %117 = vector.broadcast %cst_41 : f32 to vector<4x1xf32>
    %118 = arith.subf %117, %116 : vector<4x1xf32>
    %119 = vector.shape_cast %118 : vector<4x1xf32> to vector<1x4x1xf32>
    %cst_42 = arith.constant dense<0.000000e+00> : vector<1xf32>
    %120 = vector.multi_reduction <add>, %119, %cst_42 [1, 2] : vector<1x4x1xf32> to vector<1xf32>
    %121 = vector.shape_cast %120 : vector<1xf32> to vector<1x1x1xf32>
    %122 = vector.extract %121[0, 0, 0] : f32 from vector<1x1x1xf32>
    %cst_43 = arith.constant 4.000000e+00 : f32
    %123 = arith.divf %122, %cst_43 : f32
    %c0_44 = arith.constant 0 : index
    %c3 = arith.constant 3 : index
    %124 = memref.load %arg9[%c0_44, %c3] : memref<1x8xf32, #tpu.memory_space<smem>>
    memref.store %123, %arg9[%c0_44, %c3] : memref<1x8xf32, #tpu.memory_space<smem>>
    %c0_45 = arith.constant 0 : index
    %c0_46 = arith.constant 0 : index
    %125 = vector.load %arg2[%c0_45, %c0_46] : memref<8x128xbf16, #tpu.memory_space<vmem>>, vector<8x128xbf16>
    %c0_47 = arith.constant 0 : index
    %c0_48 = arith.constant 0 : index
    %126 = vector.load %arg4[%c0_47, %c0_48] : memref<128x128xbf16, #tpu.memory_space<vmem>>, vector<128x128xbf16>
    %cst_49 = arith.constant dense<0.000000e+00> : vector<8x128xf32>
    %127 = tpu.matmul %125, %126, %cst_49 {dimension_numbers = #tpu.dot_dimension_numbers<[1], [0], [0], [1], [0, 0, 1, 1], [], []>} : vector<8x128xbf16>, vector<128x128xbf16>, vector<8x128xf32> -> vector<8x128xf32>
    %c0_50 = arith.constant 0 : index
    %c0_51 = arith.constant 0 : index
    %128 = vector.load %arg5[%c0_50, %c0_51] : memref<1x128xf32, #tpu.memory_space<vmem>>, vector<1x128xf32>
    %129 = vector.broadcast %128 : vector<1x128xf32> to vector<8x128xf32>
    %130 = arith.addf %127, %129 : vector<8x128xf32>
    %c0_52 = arith.constant 0 : index
    %c0_53 = arith.constant 0 : index
    %131 = vector.load %arg3[%c0_52, %c0_53] : memref<8x128xbf16, #tpu.memory_space<vmem>>, vector<8x128xbf16>
    %c0_54 = arith.constant 0 : index
    %c0_55 = arith.constant 0 : index
    %132 = vector.load %arg6[%c0_54, %c0_55] : memref<128x128xbf16, #tpu.memory_space<vmem>>, vector<128x128xbf16>
    %cst_56 = arith.constant dense<0.000000e+00> : vector<8x128xf32>
    %133 = tpu.matmul %131, %132, %cst_56 {dimension_numbers = #tpu.dot_dimension_numbers<[1], [0], [0], [1], [0, 0, 1, 1], [], []>} : vector<8x128xbf16>, vector<128x128xbf16>, vector<8x128xf32> -> vector<8x128xf32>
    %c0_57 = arith.constant 0 : index
    %c0_58 = arith.constant 0 : index
    %134 = vector.load %arg7[%c0_57, %c0_58] : memref<1x128xf32, #tpu.memory_space<vmem>>, vector<1x128xf32>
    %135 = vector.broadcast %134 : vector<1x128xf32> to vector<8x128xf32>
    %136 = arith.addf %133, %135 : vector<8x128xf32>
    %137 = vector.extract_strided_slice %130 {offsets = [0, 0], sizes = [4, 128], strides = [1, 1]} : vector<8x128xf32> to vector<4x128xf32>
    %138 = vector.extract_strided_slice %136 {offsets = [0, 0], sizes = [4, 128], strides = [1, 1]} : vector<8x128xf32> to vector<4x128xf32>
    %139 = arith.mulf %137, %138 : vector<4x128xf32>
    %cst_59 = arith.constant dense<0.000000e+00> : vector<4xf32>
    %140 = vector.multi_reduction <add>, %139, %cst_59 [1] : vector<4x128xf32> to vector<4xf32>
    %141 = vector.shape_cast %140 : vector<4xf32> to vector<4x1xf32>
    %142 = arith.mulf %137, %137 : vector<4x128xf32>
    %cst_60 = arith.constant dense<0.000000e+00> : vector<4xf32>
    %143 = vector.multi_reduction <add>, %142, %cst_60 [1] : vector<4x128xf32> to vector<4xf32>
    %144 = vector.shape_cast %143 : vector<4xf32> to vector<4x1xf32>
    %145 = arith.mulf %138, %138 : vector<4x128xf32>
    %cst_61 = arith.constant dense<0.000000e+00> : vector<4xf32>
    %146 = vector.multi_reduction <add>, %145, %cst_61 [1] : vector<4x128xf32> to vector<4xf32>
    %147 = vector.shape_cast %146 : vector<4xf32> to vector<4x1xf32>
    %148 = arith.mulf %144, %147 : vector<4x1xf32>
    %cst_62 = arith.constant 1.000000e-16 : f32
    %149 = vector.broadcast %cst_62 : f32 to vector<4x1xf32>
    %150 = arith.maximumf %148, %149 : vector<4x1xf32>
    %151 = math.rsqrt %150 : vector<4x1xf32>
    %152 = arith.mulf %141, %151 : vector<4x1xf32>
    %cst_63 = arith.constant 1.000000e+00 : f32
    %153 = vector.broadcast %cst_63 : f32 to vector<4x1xf32>
    %154 = arith.subf %153, %152 : vector<4x1xf32>
    %155 = vector.shape_cast %154 : vector<4x1xf32> to vector<1x4x1xf32>
    %cst_64 = arith.constant dense<0.000000e+00> : vector<1xf32>
    %156 = vector.multi_reduction <add>, %155, %cst_64 [1, 2] : vector<1x4x1xf32> to vector<1xf32>
    %157 = vector.shape_cast %156 : vector<1xf32> to vector<1x1x1xf32>
    %158 = vector.extract %157[0, 0, 0] : f32 from vector<1x1x1xf32>
    %cst_65 = arith.constant 4.000000e+00 : f32
    %159 = arith.divf %158, %cst_65 : f32
    %c0_66 = arith.constant 0 : index
    %c4 = arith.constant 4 : index
    %160 = memref.load %arg9[%c0_66, %c4] : memref<1x8xf32, #tpu.memory_space<smem>>
    memref.store %159, %arg9[%c0_66, %c4] : memref<1x8xf32, #tpu.memory_space<smem>>
    %161 = vector.extract_strided_slice %130 {offsets = [4, 0], sizes = [4, 128], strides = [1, 1]} : vector<8x128xf32> to vector<4x128xf32>
    %162 = vector.extract_strided_slice %136 {offsets = [4, 0], sizes = [4, 128], strides = [1, 1]} : vector<8x128xf32> to vector<4x128xf32>
    %163 = arith.mulf %161, %162 : vector<4x128xf32>
    %cst_67 = arith.constant dense<0.000000e+00> : vector<4xf32>
    %164 = vector.multi_reduction <add>, %163, %cst_67 [1] : vector<4x128xf32> to vector<4xf32>
    %165 = vector.shape_cast %164 : vector<4xf32> to vector<4x1xf32>
    %166 = arith.mulf %161, %161 : vector<4x128xf32>
    %cst_68 = arith.constant dense<0.000000e+00> : vector<4xf32>
    %167 = vector.multi_reduction <add>, %166, %cst_68 [1] : vector<4x128xf32> to vector<4xf32>
    %168 = vector.shape_cast %167 : vector<4xf32> to vector<4x1xf32>
    %169 = arith.mulf %162, %162 : vector<4x128xf32>
    %cst_69 = arith.constant dense<0.000000e+00> : vector<4xf32>
    %170 = vector.multi_reduction <add>, %169, %cst_69 [1] : vector<4x128xf32> to vector<4xf32>
    %171 = vector.shape_cast %170 : vector<4xf32> to vector<4x1xf32>
    %172 = arith.mulf %168, %171 : vector<4x1xf32>
    %cst_70 = arith.constant 1.000000e-16 : f32
    %173 = vector.broadcast %cst_70 : f32 to vector<4x1xf32>
    %174 = arith.maximumf %172, %173 : vector<4x1xf32>
    %175 = math.rsqrt %174 : vector<4x1xf32>
    %176 = arith.mulf %165, %175 : vector<4x1xf32>
    %cst_71 = arith.constant 1.000000e+00 : f32
    %177 = vector.broadcast %cst_71 : f32 to vector<4x1xf32>
    %178 = arith.subf %177, %176 : vector<4x1xf32>
    %179 = vector.shape_cast %178 : vector<4x1xf32> to vector<1x4x1xf32>
    %cst_72 = arith.constant dense<0.000000e+00> : vector<1xf32>
    %180 = vector.multi_reduction <add>, %179, %cst_72 [1, 2] : vector<1x4x1xf32> to vector<1xf32>
    %181 = vector.shape_cast %180 : vector<1xf32> to vector<1x1x1xf32>
    %182 = vector.extract %181[0, 0, 0] : f32 from vector<1x1x1xf32>
    %cst_73 = arith.constant 4.000000e+00 : f32
    %183 = arith.divf %182, %cst_73 : f32
    %c0_74 = arith.constant 0 : index
    %c5 = arith.constant 5 : index
    %184 = memref.load %arg9[%c0_74, %c5] : memref<1x8xf32, #tpu.memory_space<smem>>
    memref.store %183, %arg9[%c0_74, %c5] : memref<1x8xf32, #tpu.memory_space<smem>>
    %cst_75 = arith.constant 0.000000e+00 : f32
    %c0_76 = arith.constant 0 : index
    %c6 = arith.constant 6 : index
    %185 = memref.load %arg9[%c0_76, %c6] : memref<1x8xf32, #tpu.memory_space<smem>>
    memref.store %cst_75, %arg9[%c0_76, %c6] : memref<1x8xf32, #tpu.memory_space<smem>>
    %cst_77 = arith.constant 0.000000e+00 : f32
    %c0_78 = arith.constant 0 : index
    %c7 = arith.constant 7 : index
    %186 = memref.load %arg9[%c0_78, %c7] : memref<1x8xf32, #tpu.memory_space<smem>>
    memref.store %cst_77, %arg9[%c0_78, %c7] : memref<1x8xf32, #tpu.memory_space<smem>>
    return
  }
}

module attributes {stable_mosaic.version = 11 : i64} {
  func.func @_linear_kernel(%arg0: i32, %arg1: memref<16x128xbf16, #tpu.memory_space<vmem>>, %arg2: memref<128x256xbf16, #tpu.memory_space<vmem>>, %arg3: memref<1x256xf32, #tpu.memory_space<vmem>>, %arg4: memref<16x256xf32, #tpu.memory_space<vmem>>) attributes {dimension_semantics = [#tpu.dimension_semantics<parallel>], iteration_bounds = array<i64: 2>, scalar_prefetch = 0 : i64, scratch_operands = 0 : i64, tpu.core_type = #tpu.core_type<tc>, window_params = [{transform_indices = @transform_0, window_bounds = array<i64: 16, 128>}, {pipeline_mode = #tpu.pipeline_mode<synchronous>, transform_indices = @transform_1, window_bounds = array<i64: 128, 256>}, {pipeline_mode = #tpu.pipeline_mode<synchronous>, transform_indices = @transform_2, window_bounds = array<i64: 1, 256>}, {transform_indices = @transform_3, window_bounds = array<i64: 16, 256>}]} {
    %c0 = arith.constant 0 : index
    %c0_0 = arith.constant 0 : index
    %0 = vector.load %arg1[%c0, %c0_0] : memref<16x128xbf16, #tpu.memory_space<vmem>>, vector<16x128xbf16>
    %c0_1 = arith.constant 0 : index
    %c0_2 = arith.constant 0 : index
    %1 = vector.load %arg2[%c0_1, %c0_2] : memref<128x256xbf16, #tpu.memory_space<vmem>>, vector<128x256xbf16>
    %cst = arith.constant dense<0.000000e+00> : vector<16x256xf32>
    %2 = tpu.matmul %0, %1, %cst {dimension_numbers = #tpu.dot_dimension_numbers<[1], [0], [0], [1], [0, 0, 1, 1], [], []>} : vector<16x128xbf16>, vector<128x256xbf16>, vector<16x256xf32> -> vector<16x256xf32>
    %c0_3 = arith.constant 0 : index
    %c0_4 = arith.constant 0 : index
    %3 = vector.load %arg3[%c0_3, %c0_4] : memref<1x256xf32, #tpu.memory_space<vmem>>, vector<1x256xf32>
    %4 = vector.broadcast %3 : vector<1x256xf32> to vector<16x256xf32>
    %5 = arith.addf %2, %4 : vector<16x256xf32>
    %c0_5 = arith.constant 0 : index
    %c0_6 = arith.constant 0 : index
    %6 = vector.load %arg4[%c0_5, %c0_6] : memref<16x256xf32, #tpu.memory_space<vmem>>, vector<16x256xf32>
    tpu.vector_store %arg4[%c0_5, %c0_6], %5 {strides = array<i32>} : memref<16x256xf32, #tpu.memory_space<vmem>>, vector<16x256xf32>,
    return
  }
  func.func @transform_0(%arg0: i32) -> (i32, i32) {
    %c0_i32 = arith.constant 0 : i32
    %c0_i32_0 = arith.constant 0 : i32
    return %arg0, %c0_i32 : i32, i32
  }
  func.func @transform_1(%arg0: i32) -> (i32, i32) {
    %c0_i32 = arith.constant 0 : i32
    %c0_i32_0 = arith.constant 0 : i32
    %c0_i32_1 = arith.constant 0 : i32
    return %c0_i32, %c0_i32_0 : i32, i32
  }
  func.func @transform_2(%arg0: i32) -> (i32, i32) {
    %c0_i32 = arith.constant 0 : i32
    %c0_i32_0 = arith.constant 0 : i32
    %c0_i32_1 = arith.constant 0 : i32
    return %c0_i32, %c0_i32_0 : i32, i32
  }
  func.func @transform_3(%arg0: i32) -> (i32, i32) {
    %c0_i32 = arith.constant 0 : i32
    %c0_i32_0 = arith.constant 0 : i32
    return %arg0, %c0_i32 : i32, i32
  }
}

module attributes {stable_mosaic.version = 11 : i64} {
  func.func @_sequence_losses_kernel(%arg0: memref<32x256xf32, #tpu.memory_space<vmem>>, %arg1: memref<32x256xf32, #tpu.memory_space<vmem>>, %arg2: memref<32x1xi32, #tpu.memory_space<vmem>>, %arg3: memref<32x1xf32, #tpu.memory_space<vmem>>, %arg4: memref<8x128xf32, #tpu.memory_space<vmem>>, %arg5: memref<8x128xf32, #tpu.memory_space<vmem>>, %arg6: memref<5x128xf32, #tpu.memory_space<vmem>>, %arg7: memref<5x128xf32, #tpu.memory_space<vmem>>, %arg8: memref<8x128xf32, #tpu.memory_space<vmem>>, %arg9: memref<8x128xf32, #tpu.memory_space<vmem>>, %arg10: memref<1x8xf32, #tpu.memory_space<smem>>) attributes {dimension_semantics = [], scalar_prefetch = 0 : i64, scratch_operands = 0 : i64, tpu.core_type = #tpu.core_type<tc>} {
    %c0 = arith.constant 0 : index
    %c0_0 = arith.constant 0 : index
    %0 = vector.load %arg0[%c0, %c0_0] : memref<32x256xf32, #tpu.memory_space<vmem>>, vector<32x256xf32>
    %c0_1 = arith.constant 0 : index
    %c0_2 = arith.constant 0 : index
    %1 = vector.load %arg1[%c0_1, %c0_2] : memref<32x256xf32, #tpu.memory_space<vmem>>, vector<32x256xf32>
    %c0_3 = arith.constant 0 : index
    %c0_4 = arith.constant 0 : index
    %2 = vector.load %arg2[%c0_3, %c0_4] : memref<32x1xi32, #tpu.memory_space<vmem>>, vector<32x1xi32>
    %c0_5 = arith.constant 0 : index
    %c0_6 = arith.constant 0 : index
    %3 = vector.load %arg3[%c0_5, %c0_6] : memref<32x1xf32, #tpu.memory_space<vmem>>, vector<32x1xf32>
    %cst = arith.constant dense<0xFF800000> : vector<32xf32>
    %4 = vector.multi_reduction <maximumf>, %0, %cst [1] : vector<32x256xf32> to vector<32xf32>
    %cst_7 = arith.constant 0xFF800000 : f32
    %5 = vector.broadcast %cst_7 : f32 to vector<32xf32>
    %6 = arith.maximumf %5, %4 : vector<32xf32>
    %7 = vector.shape_cast %6 : vector<32xf32> to vector<32x1xf32>
    %8 = vector.broadcast %7 : vector<32x1xf32> to vector<32x256xf32>
    %9 = arith.subf %0, %8 : vector<32x256xf32>
    %10 = math.exp %9 : vector<32x256xf32>
    %cst_8 = arith.constant dense<0.000000e+00> : vector<32xf32>
    %11 = vector.multi_reduction <add>, %10, %cst_8 [1] : vector<32x256xf32> to vector<32xf32>
    %12 = vector.shape_cast %11 : vector<32xf32> to vector<32x1xf32>
    %13 = math.log %12 : vector<32x1xf32>
    %14 = vector.broadcast %13 : vector<32x1xf32> to vector<32x256xf32>
    %15 = arith.subf %9, %14 : vector<32x256xf32>
    %cst_9 = arith.constant dense<0xFF800000> : vector<32xf32>
    %16 = vector.multi_reduction <maximumf>, %1, %cst_9 [1] : vector<32x256xf32> to vector<32xf32>
    %cst_10 = arith.constant 0xFF800000 : f32
    %17 = vector.broadcast %cst_10 : f32 to vector<32xf32>
    %18 = arith.maximumf %17, %16 : vector<32xf32>
    %19 = vector.shape_cast %18 : vector<32xf32> to vector<32x1xf32>
    %20 = vector.broadcast %19 : vector<32x1xf32> to vector<32x256xf32>
    %21 = arith.subf %1, %20 : vector<32x256xf32>
    %22 = math.exp %21 : vector<32x256xf32>
    %cst_11 = arith.constant dense<0.000000e+00> : vector<32xf32>
    %23 = vector.multi_reduction <add>, %22, %cst_11 [1] : vector<32x256xf32> to vector<32xf32>
    %24 = vector.shape_cast %23 : vector<32xf32> to vector<32x1xf32>
    %25 = math.log %24 : vector<32x1xf32>
    %26 = vector.broadcast %25 : vector<32x1xf32> to vector<32x256xf32>
    %27 = arith.subf %21, %26 : vector<32x256xf32>
    %28 = tpu.iota {dimensions = array<i32: 1>} : vector<32x256xi32>
    %29 = vector.broadcast %2 : vector<32x1xi32> to vector<32x256xi32>
    %30 = arith.cmpi eq, %28, %29 : vector<32x256xi32>
    %31 = arith.extui %30 : vector<32x256xi1> to vector<32x256xi32>
    %32 = arith.sitofp %31 : vector<32x256xi32> to vector<32x256xf32>
    %c-100_i32 = arith.constant -100 : i32
    %33 = vector.broadcast %c-100_i32 : i32 to vector<32x1xi32>
    %34 = arith.cmpi ne, %2, %33 : vector<32x1xi32>
    %35 = arith.extui %34 : vector<32x1xi1> to vector<32x1xi32>
    %36 = arith.sitofp %35 : vector<32x1xi32> to vector<32x1xf32>
    %37 = arith.mulf %15, %32 : vector<32x256xf32>
    %cst_12 = arith.constant dense<0.000000e+00> : vector<32xf32>
    %38 = vector.multi_reduction <add>, %37, %cst_12 [1] : vector<32x256xf32> to vector<32xf32>
    %39 = vector.shape_cast %38 : vector<32xf32> to vector<32x1xf32>
    %cst_13 = arith.constant 0.000000e+00 : f32
    %40 = vector.broadcast %cst_13 : f32 to vector<32x1xf32>
    %41 = arith.subf %40, %39 : vector<32x1xf32>
    %42 = arith.mulf %41, %36 : vector<32x1xf32>
    %43 = vector.shape_cast %42 : vector<32x1xf32> to vector<1x32x1xf32>
    %cst_14 = arith.constant dense<0.000000e+00> : vector<1xf32>
    %44 = vector.multi_reduction <add>, %43, %cst_14 [1, 2] : vector<1x32x1xf32> to vector<1xf32>
    %45 = vector.shape_cast %44 : vector<1xf32> to vector<1x1x1xf32>
    %46 = vector.extract %45[0, 0, 0] : f32 from vector<1x1x1xf32>
    %47 = vector.shape_cast %36 : vector<32x1xf32> to vector<1x32x1xf32>
    %cst_15 = arith.constant dense<0.000000e+00> : vector<1xf32>
    %48 = vector.multi_reduction <add>, %47, %cst_15 [1, 2] : vector<1x32x1xf32> to vector<1xf32>
    %49 = vector.shape_cast %48 : vector<1xf32> to vector<1x1x1xf32>
    %50 = vector.extract %49[0, 0, 0] : f32 from vector<1x1x1xf32>
    %cst_16 = arith.constant 1.000000e+00 : f32
    %51 = arith.maximumf %50, %cst_16 : f32
    %52 = arith.divf %46, %51 : f32
    %c0_17 = arith.constant 0 : index
    %c0_18 = arith.constant 0 : index
    %53 = memref.load %arg10[%c0_17, %c0_18] : memref<1x8xf32, #tpu.memory_space<smem>>
    memref.store %52, %arg10[%c0_17, %c0_18] : memref<1x8xf32, #tpu.memory_space<smem>>
    %54 = math.exp %27 : vector<32x256xf32>
    %55 = arith.subf %27, %15 : vector<32x256xf32>
    %56 = arith.mulf %54, %55 : vector<32x256xf32>
    %cst_19 = arith.constant dense<0.000000e+00> : vector<32xf32>
    %57 = vector.multi_reduction <add>, %56, %cst_19 [1] : vector<32x256xf32> to vector<32xf32>
    %58 = vector.shape_cast %57 : vector<32xf32> to vector<32x1xf32>
    %59 = arith.mulf %58, %3 : vector<32x1xf32>
    %60 = vector.shape_cast %59 : vector<32x1xf32> to vector<1x32x1xf32>
    %cst_20 = arith.constant dense<0.000000e+00> : vector<1xf32>
    %61 = vector.multi_reduction <add>, %60, %cst_20 [1, 2] : vector<1x32x1xf32> to vector<1xf32>
    %62 = vector.shape_cast %61 : vector<1xf32> to vector<1x1x1xf32>
    %63 = vector.extract %62[0, 0, 0] : f32 from vector<1x1x1xf32>
    %64 = vector.shape_cast %3 : vector<32x1xf32> to vector<1x32x1xf32>
    %cst_21 = arith.constant dense<0.000000e+00> : vector<1xf32>
    %65 = vector.multi_reduction <add>, %64, %cst_21 [1, 2] : vector<1x32x1xf32> to vector<1xf32>
    %66 = vector.shape_cast %65 : vector<1xf32> to vector<1x1x1xf32>
    %67 = vector.extract %66[0, 0, 0] : f32 from vector<1x1x1xf32>
    %cst_22 = arith.constant 1.000000e+00 : f32
    %68 = arith.maximumf %67, %cst_22 : f32
    %69 = arith.divf %63, %68 : f32
    %c0_23 = arith.constant 0 : index
    %c1 = arith.constant 1 : index
    %70 = memref.load %arg10[%c0_23, %c1] : memref<1x8xf32, #tpu.memory_space<smem>>
    memref.store %69, %arg10[%c0_23, %c1] : memref<1x8xf32, #tpu.memory_space<smem>>
    %c0_24 = arith.constant 0 : index
    %c0_25 = arith.constant 0 : index
    %71 = vector.load %arg4[%c0_24, %c0_25] : memref<8x128xf32, #tpu.memory_space<vmem>>, vector<8x128xf32>
    %cst_26 = arith.constant 2.000000e+01 : f32
    %72 = vector.broadcast %cst_26 : f32 to vector<8x128xf32>
    %73 = arith.mulf %71, %72 : vector<8x128xf32>
    %c0_27 = arith.constant 0 : index
    %c0_28 = arith.constant 0 : index
    %74 = vector.load %arg5[%c0_27, %c0_28] : memref<8x128xf32, #tpu.memory_space<vmem>>, vector<8x128xf32>
    %cst_29 = arith.constant 2.000000e+01 : f32
    %75 = vector.broadcast %cst_29 : f32 to vector<8x128xf32>
    %76 = arith.mulf %74, %75 : vector<8x128xf32>
    %cst_30 = arith.constant dense<0xFF800000> : vector<128xf32>
    %77 = vector.multi_reduction <maximumf>, %73, %cst_30 [0] : vector<8x128xf32> to vector<128xf32>
    %78 = vector.shape_cast %77 : vector<128xf32> to vector<1x128xf32>
    %79 = vector.broadcast %78 : vector<1x128xf32> to vector<8x128xf32>
    %80 = arith.subf %73, %79 : vector<8x128xf32>
    %cst_31 = arith.constant dense<0xFF800000> : vector<128xf32>
    %81 = vector.multi_reduction <maximumf>, %76, %cst_31 [0] : vector<8x128xf32> to vector<128xf32>
    %82 = vector.shape_cast %81 : vector<128xf32> to vector<1x128xf32>
    %83 = vector.broadcast %82 : vector<1x128xf32> to vector<8x128xf32>
    %84 = arith.subf %76, %83 : vector<8x128xf32>
    %85 = math.exp %80 : vector<8x128xf32>
    %cst_32 = arith.constant dense<0.000000e+00> : vector<128xf32>
    %86 = vector.multi_reduction <add>, %85, %cst_32 [0] : vector<8x128xf32> to vector<128xf32>
    %87 = vector.shape_cast %86 : vector<128xf32> to vector<1x128xf32>
    %88 = math.log %87 : vector<1x128xf32>
    %89 = vector.broadcast %88 : vector<1x128xf32> to vector<8x128xf32>
    %90 = arith.subf %80, %89 : vector<8x128xf32>
    %91 = math.exp %84 : vector<8x128xf32>
    %cst_33 = arith.constant dense<0.000000e+00> : vector<128xf32>
    %92 = vector.multi_reduction <add>, %91, %cst_33 [0] : vector<8x128xf32> to vector<128xf32>
    %93 = vector.shape_cast %92 : vector<128xf32> to vector<1x128xf32>
    %94 = math.log %93 : vector<1x128xf32>
    %95 = vector.broadcast %94 : vector<1x128xf32> to vector<8x128xf32>
    %96 = arith.subf %84, %95 : vector<8x128xf32>
    %97 = math.exp %96 : vector<8x128xf32>
    %98 = arith.subf %96, %90 : vector<8x128xf32>
    %99 = arith.mulf %97, %98 : vector<8x128xf32>
    %100 = vector.shape_cast %99 : vector<8x128xf32> to vector<1x8x128xf32>
    %cst_34 = arith.constant dense<0.000000e+00> : vector<1xf32>
    %101 = vector.multi_reduction <add>, %100, %cst_34 [1, 2] : vector<1x8x128xf32> to vector<1xf32>
    %102 = vector.shape_cast %101 : vector<1xf32> to vector<1x1x1xf32>
    %103 = vector.extract %102[0, 0, 0] : f32 from vector<1x1x1xf32>
    %cst_35 = arith.constant 1.280000e+02 : f32
    %104 = arith.divf %103, %cst_35 : f32
    %c0_36 = arith.constant 0 : index
    %c2 = arith.constant 2 : index
    %105 = memref.load %arg10[%c0_36, %c2] : memref<1x8xf32, #tpu.memory_space<smem>>
    memref.store %104, %arg10[%c0_36, %c2] : memref<1x8xf32, #tpu.memory_space<smem>>
    %c0_37 = arith.constant 0 : index
    %c0_38 = arith.constant 0 : index
    %106 = vector.load %arg6[%c0_37, %c0_38] : memref<5x128xf32, #tpu.memory_space<vmem>>, vector<5x128xf32>
    %cst_39 = arith.constant 2.000000e+01 : f32
    %107 = vector.broadcast %cst_39 : f32 to vector<5x128xf32>
    %108 = arith.mulf %106, %107 : vector<5x128xf32>
    %c0_40 = arith.constant 0 : index
    %c0_41 = arith.constant 0 : index
    %109 = vector.load %arg7[%c0_40, %c0_41] : memref<5x128xf32, #tpu.memory_space<vmem>>, vector<5x128xf32>
    %cst_42 = arith.constant 2.000000e+01 : f32
    %110 = vector.broadcast %cst_42 : f32 to vector<5x128xf32>
    %111 = arith.mulf %109, %110 : vector<5x128xf32>
    %cst_43 = arith.constant dense<0xFF800000> : vector<128xf32>
    %112 = vector.multi_reduction <maximumf>, %108, %cst_43 [0] : vector<5x128xf32> to vector<128xf32>
    %113 = vector.shape_cast %112 : vector<128xf32> to vector<1x128xf32>
    %114 = vector.broadcast %113 : vector<1x128xf32> to vector<5x128xf32>
    %115 = arith.subf %108, %114 : vector<5x128xf32>
    %cst_44 = arith.constant dense<0xFF800000> : vector<128xf32>
    %116 = vector.multi_reduction <maximumf>, %111, %cst_44 [0] : vector<5x128xf32> to vector<128xf32>
    %117 = vector.shape_cast %116 : vector<128xf32> to vector<1x128xf32>
    %118 = vector.broadcast %117 : vector<1x128xf32> to vector<5x128xf32>
    %119 = arith.subf %111, %118 : vector<5x128xf32>
    %120 = math.exp %115 : vector<5x128xf32>
    %cst_45 = arith.constant dense<0.000000e+00> : vector<128xf32>
    %121 = vector.multi_reduction <add>, %120, %cst_45 [0] : vector<5x128xf32> to vector<128xf32>
    %122 = vector.shape_cast %121 : vector<128xf32> to vector<1x128xf32>
    %123 = math.log %122 : vector<1x128xf32>
    %124 = vector.broadcast %123 : vector<1x128xf32> to vector<5x128xf32>
    %125 = arith.subf %115, %124 : vector<5x128xf32>
    %126 = math.exp %119 : vector<5x128xf32>
    %cst_46 = arith.constant dense<0.000000e+00> : vector<128xf32>
    %127 = vector.multi_reduction <add>, %126, %cst_46 [0] : vector<5x128xf32> to vector<128xf32>
    %128 = vector.shape_cast %127 : vector<128xf32> to vector<1x128xf32>
    %129 = math.log %128 : vector<1x128xf32>
    %130 = vector.broadcast %129 : vector<1x128xf32> to vector<5x128xf32>
    %131 = arith.subf %119, %130 : vector<5x128xf32>
    %132 = math.exp %131 : vector<5x128xf32>
    %133 = arith.subf %131, %125 : vector<5x128xf32>
    %134 = arith.mulf %132, %133 : vector<5x128xf32>
    %135 = vector.shape_cast %134 : vector<5x128xf32> to vector<1x5x128xf32>
    %cst_47 = arith.constant dense<0.000000e+00> : vector<1xf32>
    %136 = vector.multi_reduction <add>, %135, %cst_47 [1, 2] : vector<1x5x128xf32> to vector<1xf32>
    %137 = vector.shape_cast %136 : vector<1xf32> to vector<1x1x1xf32>
    %138 = vector.extract %137[0, 0, 0] : f32 from vector<1x1x1xf32>
    %cst_48 = arith.constant 1.280000e+02 : f32
    %139 = arith.divf %138, %cst_48 : f32
    %c0_49 = arith.constant 0 : index
    %c3 = arith.constant 3 : index
    %140 = memref.load %arg10[%c0_49, %c3] : memref<1x8xf32, #tpu.memory_space<smem>>
    memref.store %139, %arg10[%c0_49, %c3] : memref<1x8xf32, #tpu.memory_space<smem>>
    %c0_50 = arith.constant 0 : index
    %c0_51 = arith.constant 0 : index
    %141 = vector.load %arg8[%c0_50, %c0_51] : memref<8x128xf32, #tpu.memory_space<vmem>>, vector<8x128xf32>
    %cst_52 = arith.constant 2.000000e+01 : f32
    %142 = vector.broadcast %cst_52 : f32 to vector<8x128xf32>
    %143 = arith.mulf %141, %142 : vector<8x128xf32>
    %c0_53 = arith.constant 0 : index
    %c0_54 = arith.constant 0 : index
    %144 = vector.load %arg9[%c0_53, %c0_54] : memref<8x128xf32, #tpu.memory_space<vmem>>, vector<8x128xf32>
    %cst_55 = arith.constant 2.000000e+01 : f32
    %145 = vector.broadcast %cst_55 : f32 to vector<8x128xf32>
    %146 = arith.mulf %144, %145 : vector<8x128xf32>
    %cst_56 = arith.constant dense<0xFF800000> : vector<128xf32>
    %147 = vector.multi_reduction <maximumf>, %143, %cst_56 [0] : vector<8x128xf32> to vector<128xf32>
    %148 = vector.shape_cast %147 : vector<128xf32> to vector<1x128xf32>
    %149 = vector.broadcast %148 : vector<1x128xf32> to vector<8x128xf32>
    %150 = arith.subf %143, %149 : vector<8x128xf32>
    %cst_57 = arith.constant dense<0xFF800000> : vector<128xf32>
    %151 = vector.multi_reduction <maximumf>, %146, %cst_57 [0] : vector<8x128xf32> to vector<128xf32>
    %152 = vector.shape_cast %151 : vector<128xf32> to vector<1x128xf32>
    %153 = vector.broadcast %152 : vector<1x128xf32> to vector<8x128xf32>
    %154 = arith.subf %146, %153 : vector<8x128xf32>
    %155 = math.exp %150 : vector<8x128xf32>
    %cst_58 = arith.constant dense<0.000000e+00> : vector<128xf32>
    %156 = vector.multi_reduction <add>, %155, %cst_58 [0] : vector<8x128xf32> to vector<128xf32>
    %157 = vector.shape_cast %156 : vector<128xf32> to vector<1x128xf32>
    %158 = math.log %157 : vector<1x128xf32>
    %159 = vector.broadcast %158 : vector<1x128xf32> to vector<8x128xf32>
    %160 = arith.subf %150, %159 : vector<8x128xf32>
    %161 = math.exp %154 : vector<8x128xf32>
    %cst_59 = arith.constant dense<0.000000e+00> : vector<128xf32>
    %162 = vector.multi_reduction <add>, %161, %cst_59 [0] : vector<8x128xf32> to vector<128xf32>
    %163 = vector.shape_cast %162 : vector<128xf32> to vector<1x128xf32>
    %164 = math.log %163 : vector<1x128xf32>
    %165 = vector.broadcast %164 : vector<1x128xf32> to vector<8x128xf32>
    %166 = arith.subf %154, %165 : vector<8x128xf32>
    %167 = math.exp %166 : vector<8x128xf32>
    %168 = arith.subf %166, %160 : vector<8x128xf32>
    %169 = arith.mulf %167, %168 : vector<8x128xf32>
    %170 = vector.shape_cast %169 : vector<8x128xf32> to vector<1x8x128xf32>
    %cst_60 = arith.constant dense<0.000000e+00> : vector<1xf32>
    %171 = vector.multi_reduction <add>, %170, %cst_60 [1, 2] : vector<1x8x128xf32> to vector<1xf32>
    %172 = vector.shape_cast %171 : vector<1xf32> to vector<1x1x1xf32>
    %173 = vector.extract %172[0, 0, 0] : f32 from vector<1x1x1xf32>
    %cst_61 = arith.constant 1.280000e+02 : f32
    %174 = arith.divf %173, %cst_61 : f32
    %c0_62 = arith.constant 0 : index
    %c4 = arith.constant 4 : index
    %175 = memref.load %arg10[%c0_62, %c4] : memref<1x8xf32, #tpu.memory_space<smem>>
    memref.store %174, %arg10[%c0_62, %c4] : memref<1x8xf32, #tpu.memory_space<smem>>
    %cst_63 = arith.constant 0.000000e+00 : f32
    %c0_64 = arith.constant 0 : index
    %c5 = arith.constant 5 : index
    %176 = memref.load %arg10[%c0_64, %c5] : memref<1x8xf32, #tpu.memory_space<smem>>
    memref.store %cst_63, %arg10[%c0_64, %c5] : memref<1x8xf32, #tpu.memory_space<smem>>
    %cst_65 = arith.constant 0.000000e+00 : f32
    %c0_66 = arith.constant 0 : index
    %c6 = arith.constant 6 : index
    %177 = memref.load %arg10[%c0_66, %c6] : memref<1x8xf32, #tpu.memory_space<smem>>
    memref.store %cst_65, %arg10[%c0_66, %c6] : memref<1x8xf32, #tpu.memory_space<smem>>
    %cst_67 = arith.constant 0.000000e+00 : f32
    %c0_68 = arith.constant 0 : index
    %c7 = arith.constant 7 : index
    %178 = memref.load %arg10[%c0_68, %c7] : memref<1x8xf32, #tpu.memory_space<smem>>
    memref.store %cst_67, %arg10[%c0_68, %c7] : memref<1x8xf32, #tpu.memory_space<smem>>
    return
  }
}

</mosaic_0001>

<bundles_post_ra>
// kernel: dlip_pretrain_sigmoid_forward.16
= control target key start
LH: loop header
LB: loop body
LE: loop exit
PB: predicated region body
PF: predicated region fallthrough
CT: control target
= control target key end

     0   :  { %vm97_vm0 = vcmask 1043456   ;;  %s214_s1 = inlined_call_operand.vmem [shape: bf16[128,128], index: 1, kind: input, shape index: {}]   ;;  %s215_s2 = inlined_call_operand.vmem [shape: f32[1,128], index: 2, kind: input, shape index: {}]   ;;  %s216_s0 = inlined_call_operand.vmem [shape: bf16[4,128], index: 0, kind: input, shape index: {}]   ;;  %s217_s3 = inlined_call_operand.vmem [shape: f32[4,128], index: 3, kind: output, shape index: {}]  }
   0x1   :  { %v157_v0 = vld [vmem:[%s214_s1 + $0x38] sm:$0xff]  ;;  %v156_v1 = vld [vmem:[%s214_s1 + $0x30] sm:$0xff]  ;;  %v155_v2 = vld [vmem:[%s214_s1 + $0x28] sm:$0xff] }
   0x2   :  { %83 = vmatpush.bf16.msra.mxu0 %v157_v0  ;;  %v154_v3 = vld [vmem:[%s214_s1 + $0x20] sm:$0xff]  ;;  %v153_v4 = vld [vmem:[%s214_s1 + $0x18] sm:$0xff]  ;;  %v152_v5 = vld [vmem:[%s214_s1 + $0x10] sm:$0xff] }
   0x3   :  { %v151_v6 = vld [vmem:[%s214_s1 + $0x8] sm:$0xff]  ;;  %v150_v7 = vld [vmem:[%s214_s1] sm:$0xff] }
   0x4   :  { %v14_v8 = vld [vmem:[%s216_s0] sm:$0x3] }
   0x5   :  { %v158_v9 = vld [vmem:[%s215_s2] ss:$0 sm:$0xff] }
   0x6   :  { %84 = vmatpush.bf16.msra.mxu0 %v156_v1 }
   0xa   :  { %85 = vmatpush.bf16.msra.mxu0 %v155_v2 }
   0xe   :  { %86 = vmatpush.bf16.msra.mxu0 %v154_v3 }
  0x12   :  { %87 = vmatpush.bf16.msra.mxu0 %v153_v4 }
  0x16   :  { %88 = vmatpush.bf16.msra.mxu0 %v152_v5 }
  0x1a   :  { %89 = vmatpush.bf16.msra.mxu0 %v151_v6 }
  0x1e   :  { %90 = vmatpush.bf16.msra.mxu0 %v150_v7 }
  0x21   :  { %91 = vmatmul.bf16.vlgmr.msra.gmra.mxu0 %v14_v8 }
  0x9e   :  { %v92_v10 = vpop.f32.mrf.mxu0 }
  0x9f   :  { %v93_v11 = vadd.f32 %v158_v9, %v92_v10 }
  0xa1   :  { %v96_v12 = vmul.f32 %v93_v11, %v93_v11 }
  0xa3   :  { %v98_v13 = vsel %vm97_vm0, %v96_v12, 0.0 }
  0xa4   :  { %99 = vadd.xlane.f32.xlu0 %v98_v13 }
  0xa6   :  { %v94_v14 = vpop.f32.mrf.mxu0 }
 0x117   :  { %v100_v15 = vpop.xlane.xlu0 %99 }
 0x118   :  { %v101_v16 = vmax.f32 %v100_v15, 1e-24 }
 0x11a   :  { %159 = vrsqrt.f32 %v101_v16  ;;  %vm108_vm2 = vweird.f32 %v101_v16 }
 0x120   :  { %v160_v17 = vpop.eup %159 }
 0x121   :  { %v103_v18 = vmul.f32 %v160_v17, %v101_v16  ;;  %vm109_vm1 = vweird.f32 %v160_v17 }
 0x122   :  { %vm110_vm3 = vmor %vm108_vm2, %vm109_vm1 }
 0x123   :  { %v104_v19 = vmul.f32 %v160_v17, %v103_v18 }
 0x125   :  { %v105_v20 = vmul.f32 0.5, %v104_v19 }
 0x127   :  { %v106_v21 = vsub.f32 1.5, %v105_v20 }
 0x129   :  { %v107_v22 = vmul.f32 %v160_v17, %v106_v21 }
 0x12b   :  { %v111_v23 = vsel %vm110_vm3, %v160_v17, %v107_v22 }
 0x12c   :  { %v112_v24 = vmul.f32 %v111_v23, %v93_v11 }
 0x12e   :  { %113 = vst [vmem:[%s217_s3] sm:$0xf] %v112_v24 }

// kernel: dlip_pretrain_sigmoid_forward.14
= control target key start
LH: loop header
LB: loop body
LE: loop exit
PB: predicated region body
PF: predicated region fallthrough
CT: control target
= control target key end

     0   :  { %s1000_s12 = smov 0   ;;  %s1177_s0 = inlined_call_operand.vmem [shape: bf16[16,768], index: 0, kind: input, shape index: {}]   ;;  %s1178_s1 = inlined_call_operand.vmem [shape: bf16[768,128], index: 1, kind: input, shape index: {}]   ;;  %s1179_s2 = inlined_call_operand.vmem [shape: f32[1,128], index: 2, kind: input, shape index: {}]   ;;  %s1180_s3 = inlined_call_operand.vmem [shape: f32[16,128], index: 3, kind: output, shape index: {}]  }
   0x1 LB: > { %s713_s13 = sadd.s32 4294967295, %s978_s12   ;;  %p717_p0 = scmp.ge.s32.totalorder %s978_s12, 1  ;;  %s978_s12 = sphi %s1000_s12, %s13_s12  }
   0x2   : > { %p137_p1 = scmp.lt.s32.totalorder %s978_s12, 3 }
   0x4   : > { %p138_p2 = pnand %p717_p0, %p137_p1 }
   0x5   : > { %p160_p3 = scmp.lt.s32.totalorder (!%p138_p2), %s713_s13, 1 }
   0x6   : > { %141 = sbr.rel (%p138_p2) target bundleno = 210 (0xd2), region = 32 }
   0xb   : > { %v921_v0 = vld [vmem:[%s1178_s1 + $0x38] sm:$0xff]  ;;  %v920_v2 = vld [vmem:[%s1178_s1 + $0x30] sm:$0xff]  ;;  %v919_v8 = vld [vmem:[%s1178_s1 + $0x28] sm:$0xff]  ;;  %s1182_s13 = smov (!%p160_p3, %s713_s13), 1 }
   0xc   : > { %v929_v1 = vld [vmem:[%s1178_s1 + $0x78] sm:$0xff]  ;;  %581 = vmatpush.bf16.msra.mxu0 %v921_v0  ;;  %v928_v3 = vld [vmem:[%s1178_s1 + $0x70] sm:$0xff]  ;;  %v927_v9 = vld [vmem:[%s1178_s1 + $0x68] sm:$0xff]  ;;  %s962_s25 = smul.u32 24, %s1182_s13  ;;  %s719_s17 = sshll.u32 %s1182_s13, 3 }
   0xd   : > { %594 = vmatpush.bf16.msra.mxu1 %v929_v1  ;;  %v937_v4 = vld [vmem:[%s1178_s1 + $0xb8] sm:$0xff]  ;;  %v936_v6 = vld [vmem:[%s1178_s1 + $0xb0] sm:$0xff]  ;;  %v935_v10 = vld [vmem:[%s1178_s1 + $0xa8] sm:$0xff]  ;;  %s168_s20 = scalar_lea.vmem %s1180_s3, %s719_s17 }
   0xe   : > { %v945_v5 = vld [vmem:[%s1178_s1 + $0xf8] sm:$0xff]  ;;  %607 = vmatpush.bf16.msra.mxu2 %v937_v4  ;;  %v944_v7 = vld [vmem:[%s1178_s1 + $0xf0] sm:$0xff]  ;;  %v943_v11 = vld [vmem:[%s1178_s1 + $0xe8] sm:$0xff]  ;;  %s1084_s9 = scalar_lea.vmem %s1177_s0, %s962_s25 }
   0xf   : > { %620 = vmatpush.bf16.msra.mxu3 %v945_v5  ;;  %v918_v12 = vld [vmem:[%s1178_s1 + $0x20] sm:$0xff]  ;;  %v917_v16 = vld [vmem:[%s1178_s1 + $0x18] sm:$0xff]  ;;  %v916_v20 = vld [vmem:[%s1178_s1 + $0x10] sm:$0xff] }
  0x10   : > { %582 = vmatpush.bf16.msra.mxu0 %v920_v2  ;;  %v926_v13 = vld [vmem:[%s1178_s1 + $0x60] sm:$0xff]  ;;  %v925_v17 = vld [vmem:[%s1178_s1 + $0x58] sm:$0xff]  ;;  %v924_v21 = vld [vmem:[%s1178_s1 + $0x50] sm:$0xff] }
  0x11   : > { %595 = vmatpush.bf16.msra.mxu1 %v928_v3  ;;  %v934_v14 = vld [vmem:[%s1178_s1 + $0xa0] sm:$0xff]  ;;  %v933_v18 = vld [vmem:[%s1178_s1 + $0x98] sm:$0xff]  ;;  %v932_v22 = vld [vmem:[%s1178_s1 + $0x90] sm:$0xff] }
  0x12   : > { %608 = vmatpush.bf16.msra.mxu2 %v936_v6  ;;  %v942_v15 = vld [vmem:[%s1178_s1 + $0xe0] sm:$0xff]  ;;  %v941_v19 = vld [vmem:[%s1178_s1 + $0xd8] sm:$0xff]  ;;  %v940_v23 = vld [vmem:[%s1178_s1 + $0xd0] sm:$0xff] }
  0x13   : > { %621 = vmatpush.bf16.msra.mxu3 %v944_v7  ;;  %v915_v24 = vld [vmem:[%s1178_s1 + $0x8] sm:$0xff]  ;;  %v169_v26 = vld [vmem:[%s1084_s9] sm:$0xff]  ;;  %v953_v34 = vld [vmem:[%s1178_s1 + $0x138] sm:$0xff] }
  0x14   : > { %583 = vmatpush.bf16.msra.mxu0 %v919_v8  ;;  %v923_v25 = vld [vmem:[%s1178_s1 + $0x48] sm:$0xff]  ;;  %v275_v29 = vunpack.c.l.b16 %v169_v26  ;;  %v276_v30 = vunpack.c.h.b16 %v169_v26  ;;  %v914_v32 = vld [vmem:[%s1178_s1] sm:$0xff]  ;;  %v961_v35 = vld [vmem:[%s1178_s1 + $0x178] sm:$0xff] }
  0x15   : > { %596 = vmatpush.bf16.msra.mxu1 %v927_v9  ;;  %v931_v27 = vld [vmem:[%s1178_s1 + $0x88] sm:$0xff]  ;;  %v922_v33 = vld [vmem:[%s1178_s1 + $0x40] sm:$0xff]  ;;  %v952_v42 = vld [vmem:[%s1178_s1 + $0x130] sm:$0xff] }
  0x16   : > { %609 = vmatpush.bf16.msra.mxu2 %v935_v10  ;;  %v939_v28 = vld [vmem:[%s1178_s1 + $0xc8] sm:$0xff]  ;;  %v930_v36 = vld [vmem:[%s1178_s1 + $0x80] sm:$0xff]  ;;  %v281_v40 = vpack.c.b16 %v275_v29, %v275_v29  ;;  %v282_v41 = vpack.c.b16 %v276_v30, %v276_v30  ;;  %v960_v43 = vld [vmem:[%s1178_s1 + $0x170] sm:$0xff] }
  0x17   : > { %622 = vmatpush.bf16.msra.mxu3 %v943_v11  ;;  %v170_v31 = vld [vmem:[%s1084_s9 + $0x8] sm:$0xff]  ;;  %v938_v37 = vld [vmem:[%s1178_s1 + $0xc0] sm:$0xff]  ;;  %v949_v50 = vld [vmem:[%s1178_s1 + $0x118] sm:$0xff] }
  0x18   : > { %584 = vmatpush.bf16.msra.mxu0 %v918_v12  ;;  %v277_v38 = vunpack.c.l.b16 %v170_v31  ;;  %v278_v39 = vunpack.c.h.b16 %v170_v31  ;;  %v951_v46 = vld [vmem:[%s1178_s1 + $0x128] sm:$0xff]  ;;  %v950_v48 = vld [vmem:[%s1178_s1 + $0x120] sm:$0xff]  ;;  %v957_v51 = vld [vmem:[%s1178_s1 + $0x158] sm:$0xff] }
  0x19   : > { %597 = vmatpush.bf16.msra.mxu1 %v926_v13  ;;  %v959_v47 = vld [vmem:[%s1178_s1 + $0x168] sm:$0xff]  ;;  %v958_v49 = vld [vmem:[%s1178_s1 + $0x160] sm:$0xff]  ;;  %v948_v52 = vld [vmem:[%s1178_s1 + $0x110] sm:$0xff] }
  0x1a   : > { %610 = vmatpush.bf16.msra.mxu2 %v934_v14  ;;  %v283_v44 = vpack.c.b16 %v277_v38, %v277_v38  ;;  %v284_v45 = vpack.c.b16 %v278_v39, %v278_v39  ;;  %v956_v53 = vld [vmem:[%s1178_s1 + $0x150] sm:$0xff]  ;;  %v947_v54 = vld [vmem:[%s1178_s1 + $0x108] sm:$0xff]  ;;  %v946_v59 = vld [vmem:[%s1178_s1 + $0x100] sm:$0xff] }
  0x1b   : > { %623 = vmatpush.bf16.msra.mxu3 %v942_v15  ;;  %v955_v55 = vld [vmem:[%s1178_s1 + $0x148] sm:$0xff]  ;;  %v171_v56 = vld [vmem:[%s1084_s9 + $0x10] sm:$0xff]  ;;  %v954_v60 = vld [vmem:[%s1178_s1 + $0x140] sm:$0xff] }
  0x1c   : > { %585 = vmatpush.bf16.msra.mxu0 %v917_v16  ;;  %v279_v57 = vunpack.c.l.b16 %v171_v56  ;;  %v280_v58 = vunpack.c.h.b16 %v171_v56  ;;  %v971_v5 = vld [vmem:[%s1179_s2] ss:$0 sm:$0xff] }
  0x1d   : > { %598 = vmatpush.bf16.msra.mxu1 %v925_v17 }
  0x1e   : > { %611 = vmatpush.bf16.msra.mxu2 %v933_v18  ;;  %v285_v61 = vpack.c.b16 %v279_v57, %v279_v57  ;;  %v286_v62 = vpack.c.b16 %v280_v58, %v280_v58 }
  0x1f   : > { %624 = vmatpush.bf16.msra.mxu3 %v941_v19 }
  0x20   : > { %586 = vmatpush.bf16.msra.mxu0 %v916_v20 }
  0x21   : > { %599 = vmatpush.bf16.msra.mxu1 %v924_v21 }
  0x22   : > { %612 = vmatpush.bf16.msra.mxu2 %v932_v22 }
  0x23   : > { %625 = vmatpush.bf16.msra.mxu3 %v940_v23 }
  0x24   : > { %587 = vmatpush.bf16.msra.mxu0 %v915_v24 }
  0x25   : > { %600 = vmatpush.bf16.msra.mxu1 %v923_v25 }
  0x26   : > { %613 = vmatpush.bf16.msra.mxu2 %v931_v27 }
  0x27   : > { %626 = vmatpush.bf16.msra.mxu3 %v939_v28 }
  0x28   : > { %588 = vmatpush.bf16.msra.mxu0 %v914_v32 }
  0x29   : > { %601 = vmatpush.bf16.msra.mxu1 %v922_v33 }
  0x2a   : > { %614 = vmatpush.bf16.msra.mxu2 %v930_v36 }
  0x2b   : > { %627 = vmatpush.bf16.msra.mxu3 %v938_v37  ;;  %589 = vmatmul.bf16.vlgmr.msra.gmra.mxu0 %v281_v40 }
  0x2c   : > { %633 = vmatpush.bf16.msrb.mxu0 %v953_v34  ;;  %602 = vmatmul.bf16.vlgmr.msra.gmra.mxu1 %v282_v41 }
  0x2d   : > { %646 = vmatpush.bf16.msrb.mxu1 %v961_v35  ;;  %615 = vmatmul.bf16.vlgmr.msra.gmra.mxu2 %v283_v44 }
  0x2e   : > { %628 = vmatmul.bf16.vlgmr.msra.gmra.mxu3 %v284_v45 }
  0x30   : > { %634 = vmatpush.bf16.msrb.mxu0 %v952_v42 }
  0x31   : > { %647 = vmatpush.bf16.msrb.mxu1 %v960_v43 }
  0x34   : > { %635 = vmatpush.bf16.msrb.mxu0 %v951_v46 }
  0x35   : > { %648 = vmatpush.bf16.msrb.mxu1 %v959_v47 }
  0x38   : > { %636 = vmatpush.bf16.msrb.mxu0 %v950_v48 }
  0x39   : > { %649 = vmatpush.bf16.msrb.mxu1 %v958_v49 }
  0x3c   : > { %637 = vmatpush.bf16.msrb.mxu0 %v949_v50 }
  0x3d   : > { %650 = vmatpush.bf16.msrb.mxu1 %v957_v51 }
  0x40   : > { %638 = vmatpush.bf16.msrb.mxu0 %v948_v52 }
  0x41   : > { %651 = vmatpush.bf16.msrb.mxu1 %v956_v53 }
  0x44   : > { %639 = vmatpush.bf16.msrb.mxu0 %v947_v54 }
  0x45   : > { %652 = vmatpush.bf16.msrb.mxu1 %v955_v55 }
  0x48   : > { %640 = vmatpush.bf16.msrb.mxu0 %v946_v59 }
  0x49   : > { %653 = vmatpush.bf16.msrb.mxu1 %v954_v60 }
  0x4b   : > { %641 = vmatmul.bf16.vlgmr.msrb.gmra.mxu0 %v285_v61 }
  0x4c   : > { %654 = vmatmul.bf16.vlgmr.msrb.gmra.mxu1 %v286_v62 }
  0xa8   : > { %v590_v63 = vpop.f32.mrf.mxu0 }
  0xa9   : > { %v603_v0 = vpop.f32.mrf.mxu1  ;;  %v591_v6 = vadd.f32 %v971_v5, %v590_v63 }
  0xab   : > { %v604_v9 = vadd.f32 %v603_v0, %v591_v6 }
  0xb0   : > { %v592_v1 = vpop.f32.mrf.mxu0  ;;  %v616_v3 = vpop.f32.mrf.mxu2 }
  0xb1   : > { %v605_v2 = vpop.f32.mrf.mxu1  ;;  %v629_v4 = vpop.f32.mrf.mxu3  ;;  %v617_v10 = vadd.f32 %v616_v3, %v604_v9 }
  0xb3   : > { %v630_v11 = vadd.f32 %v629_v4, %v617_v10 }
  0xb8   : > { %v618_v7 = vpop.f32.mrf.mxu2 }
  0xb9   : > { %v631_v8 = vpop.f32.mrf.mxu3 }
  0xc8   : > { %v642_v12 = vpop.f32.mrf.mxu0 }
  0xc9   : > { %v655_v13 = vpop.f32.mrf.mxu1  ;;  %v643_v14 = vadd.f32 %v642_v12, %v630_v11 }
  0xcb   : > { %v656_v15 = vadd.f32 %v655_v13, %v643_v14 }
  0xcd   : > { %659 = vst [vmem:[%s168_s20] sm:$0xff] %v656_v15 }
  0xd0   : > { %v644_v16 = vpop.f32.mrf.mxu0 }
  0xd1   : > { %v657_v17 = vpop.f32.mrf.mxu1 }
  0xd2 PF: > { %s13_s12 = sadd.s32 1, %s978_s12  }
  0xd3   : > { %p10_p4 = scmp.ge.s32.totalorder %s13_s12, 4  }
  0xd5   :  { %12 = sbr.rel (!%p10_p4) target bundleno = 1 (0x1), region = 62 }

// kernel: tile.8
= control target key start
LH: loop header
LB: loop body
LE: loop exit
PB: predicated region body
PF: predicated region fallthrough
CT: control target
= control target key end

     0   :  { %s22_s0 = inlined_call_operand.vmem [shape: f32[8], index: 0, kind: input, shape index: {}]   ;;  %s23_s1 = inlined_call_operand.vmem [shape: f32[4,8], index: 1, kind: output, shape index: {}]  }
   0x1   :  { %v4_v0 = vld [vmem:[%s22_s0] ss:$0 sm:$0xff] }
   0x2   :  { %5 = vst [vmem:[%s23_s1] sm:$0xf] %v4_v0 }

// kernel: tile.0
= control target key start
LH: loop header
LB: loop body
LE: loop exit
PB: predicated region body
PF: predicated region fallthrough
CT: control target
= control target key end

     0   :  { %s66_s8 = smov 125   ;;  %s67_s9 = smov 123   ;;  %vm7_vm0 = vcmask 7168   ;;  %s117_s0 = inlined_call_operand.vmem [shape: f32[4,8], index: 0, kind: input, shape index: {}]   ;;  %s118_s1 = inlined_call_operand.vmem [shape: f32[32,1], index: 1, kind: output, shape index: {}]  }
   0x1   :  { %v4_v0 = vld [vmem:[%s117_s0] sm:$0xf]  ;;  %s65_s0 = smov 127   ;;  %s68_s10 = smov 126  }
   0x2   :  { %5 = vst [vmem:[#allocation0] sm:$0xf] %v4_v0  ;;  %s69_s11 = smov 124   ;;  %s70_s12 = smov 122  }
   0x3   :  { %s71_s13 = smov 121  }
   0x9   :  { %v9_v1 = vld [vmem:[#allocation0] sm:$0xf]  }
   0xa   :  { %v21_v2 = vld [vmem:[#allocation0] sm:$0xf]   ;;  %10 = vrot.lane.b32.xlu0 %v9_v1, %s65_s0 }
   0xb   :  { %22 = vrot.lane.b32.xlu1 %v21_v2, %s66_s8  ;;  %v33_v3 = vld [vmem:[#allocation0] sm:$0xf]  }
   0xc   :  { %34 = vrot.lane.b32.xlu2 %v33_v3, %s67_s9  ;;  %v15_v4 = vld [vmem:[#allocation0] sm:$0xf]  }
   0xd   :  { %v27_v5 = vld [vmem:[#allocation0] sm:$0xf]  }
   0xe   :  { %v39_v6 = vld [vmem:[#allocation0] sm:$0xf]  }
   0xf   :  { %v45_v7 = vld [vmem:[#allocation0] sm:$0xf]  }
  0x10   :  { %v6_v8 = vld [vmem:[#allocation0] sm:$0xf]  }
  0x11   :  { %8 = vst.msk [vmem:[%s118_s1] ss:$8 sm:$0xf] %vm7_vm0, %v6_v8  }
  0x12   :  { %16 = vrot.lane.b32.xlu0 %v15_v4, %s68_s10 }
  0x13   :  { %28 = vrot.lane.b32.xlu1 %v27_v5, %s69_s11 }
  0x14   :  { %40 = vrot.lane.b32.xlu2 %v39_v6, %s70_s12 }
  0x1a   :  { %46 = vrot.lane.b32.xlu0 %v45_v7, %s71_s13 }
  0x66   :  { %v35_v9 = vpop.permute.xlu2 %34  }
  0x67   :  { %55 = vst.msk [vmem:[%s118_s1 + $0x5] ss:$8 sm:$0xf] %vm7_vm0, %v35_v9  }
  0x6e   :  { %v41_v10 = vpop.permute.xlu2 %40  }
  0x6f   :  { %56 = vst.msk [vmem:[%s118_s1 + $0x6] ss:$8 sm:$0xf] %vm7_vm0, %v41_v10  }
  0x7c   :  { %v11_v11 = vpop.permute.xlu0 %10  }
  0x7d   :  { %v23_v12 = vpop.permute.xlu1 %22   ;;  %51 = vst.msk [vmem:[%s118_s1 + $0x1] ss:$8 sm:$0xf] %vm7_vm0, %v11_v11  }
  0x7e   :  { %53 = vst.msk [vmem:[%s118_s1 + $0x3] ss:$8 sm:$0xf] %vm7_vm0, %v23_v12  }
  0x84   :  { %v17_v13 = vpop.permute.xlu0 %16  }
  0x85   :  { %v29_v14 = vpop.permute.xlu1 %28   ;;  %52 = vst.msk [vmem:[%s118_s1 + $0x2] ss:$8 sm:$0xf] %vm7_vm0, %v17_v13  }
  0x86   :  { %54 = vst.msk [vmem:[%s118_s1 + $0x4] ss:$8 sm:$0xf] %vm7_vm0, %v29_v14  }
  0x8c   :  { %v47_v15 = vpop.permute.xlu0 %46  }
  0x8d   :  { %57 = vst.msk [vmem:[%s118_s1 + $0x7] ss:$8 sm:$0xf] %vm7_vm0, %v47_v15  }

// kernel: dlip_pretrain_sigmoid_forward.13
= control target key start
LH: loop header
LB: loop body
LE: loop exit
PB: predicated region body
PF: predicated region fallthrough
CT: control target
= control target key end

     0   :  { %s510_s12 = smov 0   ;;  %s628_s0 = inlined_call_operand.vmem [shape: bf16[32,128], index: 0, kind: input, shape index: {}]   ;;  %s629_s1 = inlined_call_operand.vmem [shape: bf16[128,256], index: 1, kind: input, shape index: {}]   ;;  %s630_s2 = inlined_call_operand.vmem [shape: f32[1,256], index: 2, kind: input, shape index: {}]   ;;  %s631_s3 = inlined_call_operand.vmem [shape: f32[32,256], index: 3, kind: output, shape index: {}]  }
   0x1 LB: > { %s376_s13 = sadd.s32 4294967295, %s488_s12   ;;  %p380_p0 = scmp.ge.s32.totalorder %s488_s12, 1  ;;  %s488_s12 = sphi %s510_s12, %s13_s12  }
   0x2   : > { %p138_p1 = scmp.lt.s32.totalorder %s488_s12, 3 }
   0x4   : > { %p139_p2 = pnand %p380_p0, %p138_p1 }
   0x5   : > { %s381_s29 = sshll.u32 (!%p139_p2), %s376_s13, 1 }
   0x6   : > { %142 = sbr.rel (%p139_p2) target bundleno = 183 (0xb7), region = 32  ;;  %p164_p3 = scmp.lt.s32.totalorder (!%p139_p2), %s381_s29, 3 }
   0xb   : > { %v448_v0 = vld [vmem:[%s629_s1 + $0x70] sm:$0xf]  ;;  %v473_v1 = vld [vmem:[%s629_s1 + $0x74] sm:$0xf0]  ;;  %v472_v2 = vld [vmem:[%s629_s1 + $0x74] sm:$0xf] }
   0xc   : > { %v449_v3 = vor.u32 %v473_v1, %v448_v0  ;;  %v450_v4 = vld [vmem:[%s629_s1 + $0x78] sm:$0xf0]  ;;  %v440_v5 = vld [vmem:[%s629_s1 + $0x60] sm:$0xf]  ;;  %v471_v6 = vld [vmem:[%s629_s1 + $0x64] sm:$0xf0] }
   0xd   : > { %v453_v7 = vor.u32 %v472_v2, %v450_v4  ;;  %v470_v8 = vld [vmem:[%s629_s1 + $0x64] sm:$0xf]  ;;  %v442_v9 = vld [vmem:[%s629_s1 + $0x68] sm:$0xf0]  ;;  %v441_v10 = vor.u32 %v471_v6, %v440_v5  ;;  %v432_v12 = vld [vmem:[%s629_s1 + $0x50] sm:$0xf] }
   0xe   : > { %286 = vmatpush.bf16.msra.mxu0 %v449_v3  ;;  %v445_v11 = vor.u32 %v470_v8, %v442_v9  ;;  %v469_v13 = vld [vmem:[%s629_s1 + $0x54] sm:$0xf0]  ;;  %v468_v14 = vld [vmem:[%s629_s1 + $0x54] sm:$0xf]  ;;  %v434_v15 = vld [vmem:[%s629_s1 + $0x58] sm:$0xf0] }
   0xf   : > { %300 = vmatpush.bf16.msra.mxu1 %v453_v7  ;;  %v433_v16 = vor.u32 %v469_v13, %v432_v12  ;;  %v437_v17 = vor.u32 %v468_v14, %v434_v15  ;;  %v424_v18 = vld [vmem:[%s629_s1 + $0x40] sm:$0xf]  ;;  %v467_v19 = vld [vmem:[%s629_s1 + $0x44] sm:$0xf0]  ;;  %v466_v20 = vld [vmem:[%s629_s1 + $0x44] sm:$0xf] }
  0x10   : > { %v426_v21 = vld [vmem:[%s629_s1 + $0x48] sm:$0xf0]  ;;  %v425_v22 = vor.u32 %v467_v19, %v424_v18  ;;  %v416_v24 = vld [vmem:[%s629_s1 + $0x30] sm:$0xf]  ;;  %v465_v25 = vld [vmem:[%s629_s1 + $0x34] sm:$0xf0] }
  0x11   : > { %v429_v23 = vor.u32 %v466_v20, %v426_v21  ;;  %v464_v26 = vld [vmem:[%s629_s1 + $0x34] sm:$0xf]  ;;  %v418_v27 = vld [vmem:[%s629_s1 + $0x38] sm:$0xf0]  ;;  %v417_v28 = vor.u32 %v465_v25, %v416_v24  ;;  %v408_v30 = vld [vmem:[%s629_s1 + $0x20] sm:$0xf] }
  0x12   : > { %287 = vmatpush.bf16.msra.mxu0 %v441_v10  ;;  %v421_v29 = vor.u32 %v464_v26, %v418_v27  ;;  %v463_v31 = vld [vmem:[%s629_s1 + $0x24] sm:$0xf0]  ;;  %v462_v32 = vld [vmem:[%s629_s1 + $0x24] sm:$0xf]  ;;  %v410_v33 = vld [vmem:[%s629_s1 + $0x28] sm:$0xf0] }
  0x13   : > { %301 = vmatpush.bf16.msra.mxu1 %v445_v11  ;;  %v409_v34 = vor.u32 %v463_v31, %v408_v30  ;;  %v413_v35 = vor.u32 %v462_v32, %v410_v33  ;;  %v400_v36 = vld [vmem:[%s629_s1 + $0x10] sm:$0xf]  ;;  %v461_v37 = vld [vmem:[%s629_s1 + $0x14] sm:$0xf0]  ;;  %s633_s29 = smov (!%p164_p3, %s381_s29), 3 }
  0x14   : > { %v460_v38 = vld [vmem:[%s629_s1 + $0x14] sm:$0xf]  ;;  %v402_v39 = vld [vmem:[%s629_s1 + $0x18] sm:$0xf0]  ;;  %v401_v40 = vor.u32 %v461_v37, %v400_v36  ;;  %v392_v42 = vld [vmem:[%s629_s1] sm:$0xf] }
  0x15   : > { %v405_v41 = vor.u32 %v460_v38, %v402_v39  ;;  %v459_v43 = vld [vmem:[%s629_s1 + $0x4] sm:$0xf0]  ;;  %s382_s24 = sshll.u32 %s633_s29, 2  ;;  %v458_v44 = vld [vmem:[%s629_s1 + $0x4] sm:$0xf]  ;;  %s456_s8 = sshll.u32 %s633_s29, 4 }
  0x16   : > { %288 = vmatpush.bf16.msra.mxu0 %v433_v16  ;;  %v394_v45 = vld [vmem:[%s629_s1 + $0x8] sm:$0xf0]  ;;  %v393_v46 = vor.u32 %v459_v43, %v392_v42  ;;  %s167_s5 = scalar_lea.vmem %s628_s0, %s382_s24  ;;  %v194_v49 = vld [vmem:[%s630_s2] sm:$0x3]  ;;  %s174_s13 = scalar_lea.vmem %s631_s3, %s456_s8 }
  0x17   : > { %302 = vmatpush.bf16.msra.mxu1 %v437_v17  ;;  %v397_v47 = vor.u32 %v458_v44, %v394_v45  ;;  %v457_v48 = vld [vmem:[%s167_s5] sm:$0xff]  ;;  %v196_v50 = vperm.slane %v194_v49, 0  ;;  %v197_v51 = vperm.slane %v194_v49, 1 }
  0x1a   : > { %289 = vmatpush.bf16.msra.mxu0 %v425_v22 }
  0x1b   : > { %303 = vmatpush.bf16.msra.mxu1 %v429_v23 }
  0x1e   : > { %290 = vmatpush.bf16.msra.mxu0 %v417_v28 }
  0x1f   : > { %304 = vmatpush.bf16.msra.mxu1 %v421_v29 }
  0x22   : > { %291 = vmatpush.bf16.msra.mxu0 %v409_v34 }
  0x23   : > { %305 = vmatpush.bf16.msra.mxu1 %v413_v35 }
  0x26   : > { %292 = vmatpush.bf16.msra.mxu0 %v401_v40 }
  0x27   : > { %306 = vmatpush.bf16.msra.mxu1 %v405_v41 }
  0x2a   : > { %293 = vmatpush.bf16.msra.mxu0 %v393_v46 }
  0x2b   : > { %307 = vmatpush.bf16.msra.mxu1 %v397_v47 }
  0x2d   : > { %294 = vmatmul.bf16.vlgmr.msra.gmra.mxu0 %v457_v48 }
  0x2e   : > { %308 = vmatmul.bf16.vlgmr.msra.gmra.mxu1 %v457_v48 }
  0xaa   : > { %v295_v52 = vpop.f32.mrf.mxu0 }
  0xab   : > { %v296_v53 = vadd.f32 %v295_v52, %v196_v50  ;;  %v309_v54 = vpop.f32.mrf.mxu1 }
  0xac   : > { %v310_v55 = vadd.f32 %v309_v54, %v197_v51 }
  0xad   : > { %314 = vst [vmem:[%s174_s13] sm:$0xff] %v296_v53 }
  0xae   : > { %315 = vst [vmem:[%s174_s13 + $0x8] sm:$0xff] %v310_v55 }
  0xb2   : > { %v297_v56 = vpop.f32.mrf.mxu0 }
  0xb3   : > { %v298_v57 = vadd.f32 %v297_v56, %v196_v50  ;;  %v311_v58 = vpop.f32.mrf.mxu1 }
  0xb4   : > { %v312_v59 = vadd.f32 %v311_v58, %v197_v51 }
  0xb5   : > { %316 = vst [vmem:[%s174_s13 + $0x10] sm:$0xff] %v298_v57 }
  0xb6   : > { %317 = vst [vmem:[%s174_s13 + $0x18] sm:$0xff] %v312_v59 }
  0xb7 PF: > { %s13_s12 = sadd.s32 1, %s488_s12  }
  0xb8   : > { %p10_p4 = scmp.ge.s32.totalorder %s13_s12, 4  }
  0xba   :  { %12 = sbr.rel (!%p10_p4) target bundleno = 1 (0x1), region = 62 }

// kernel: dlip_pretrain_sigmoid_forward.18
= control target key start
LH: loop header
LB: loop body
LE: loop exit
PB: predicated region body
PF: predicated region fallthrough
CT: control target
= control target key end

     0   :  { %14 = vsyncpa [#allocation3], 0  ;;  %s909_s0 = inlined_call_operand.vmem [shape: f32[8,128], index: 0, kind: input, shape index: {}]   ;;  %s910_s1 = inlined_call_operand.vmem [shape: f32[8,128], index: 1, kind: input, shape index: {}]   ;;  %s911_s2 = inlined_call_operand.vmem [shape: bf16[8,128], index: 2, kind: input, shape index: {}]   ;;  %s912_s3 = inlined_call_operand.vmem [shape: bf16[8,128], index: 3, kind: input, shape index: {}]   ;;  %s913_s4 = inlined_call_operand.vmem [shape: bf16[128,128], index: 4, kind: input, shape index: {}]   ;;  %s914_s5 = inlined_call_operand.vmem [shape: f32[1,128], index: 5, kind: input, shape index: {}]   ;;  %s915_s6 = inlined_call_operand.vmem [shape: bf16[128,128], index: 6, kind: input, shape index: {}]   ;;  %s916_s7 = inlined_call_operand.vmem [shape: f32[1,128], index: 7, kind: input, shape index: {}]   ;;  %s917_s8 = inlined_call_operand.vmem [shape: f32[1,2], index: 8, kind: input, shape index: {}]   ;;  %s918_s9 = inlined_call_operand.vmem [shape: f32[1,8], index: 9, kind: output, shape index: {}]  }
   0x1   :  { %15 = vsyncpa [#allocation4], 0  ;;  %s37_s11 = sshll.u32 %s917_s8, 4  ;;  %s732_s12 = smov [#allocation2]   ;;  %s38_s11 = int_to_ptr.vmem [resolvable:$true] %s37_s11 }
   0x2   :  { %40 = dma.vmem_to_smem %s38_s11, 16, %s732_s12, [#allocation3]  }
   0x3   :  { %728 = dma.done.wait [#allocation3], 16  }
   0x4   :  { %729 = vsyncadd [#allocation3], 4294967280 }
   0x5   :  { %45 = sfence }
   0x6   :  { %v794_v0 = vld [vmem:[%s910_s1] sm:$0xff]  ;;  %v647_v1 = vld [vmem:[%s913_s4 + $0x38] sm:$0xff]  ;;  %s46_s8 = sld [smem:[#allocation2]]  ;;  %v646_v4 = vld [vmem:[%s913_s4 + $0x30] sm:$0xff]  ;;  %vm201_vm0 = vcmask 1047556   ;;  %vm193_vm1 = vcmask 1043456   ;;  %v78_v27 = vlaneseq }
   0x7   :  { %v655_v2 = vld [vmem:[%s915_s6 + $0x38] sm:$0xff]  ;;  %69 = vmatpush.xpose.msra.mxu0 %v794_v0  ;;  %v806_v3 = vld [vmem:[%s909_s0] sm:$0xff]  ;;  %365 = vmatpush.bf16.msra.mxu1 %v647_v1  ;;  %v654_v5 = vld [vmem:[%s915_s6 + $0x30] sm:$0xff]  ;;  %v197_v28 = vmul.f32 %v794_v0, %v794_v0  ;;  %v734_v37 = vmov -1.0   ;;  %v190_v57 = vrot.slane %v794_v0, 4  ;;  %vm111_vm5 = vcmask 27648  }
   0x8   :  { %447 = vmatpush.bf16.msra.mxu2 %v655_v2  ;;  %v645_v6 = vld [vmem:[%s913_s4 + $0x28] sm:$0xff]  ;;  %v644_v10 = vld [vmem:[%s913_s4 + $0x20] sm:$0xff]  ;;  %v643_v12 = vld [vmem:[%s913_s4 + $0x18] sm:$0xff]  ;;  %v251_v23 = vmul.f32 %v806_v3, %v806_v3  ;;  %v79_v33 = vshrl.u32 %v78_v27, 7  ;;  %v81_v34 = vand.u32 127, %v78_v27  ;;  %s736_s11 = smov 0.0  }
   0x9   :  { %v653_v7 = vld [vmem:[%s915_s6 + $0x28] sm:$0xff]  ;;  %v652_v11 = vld [vmem:[%s915_s6 + $0x20] sm:$0xff]  ;;  %v651_v13 = vld [vmem:[%s915_s6 + $0x18] sm:$0xff]  ;;  %v198_v31 = vsel %vm193_vm1, %v197_v28, 0.0  ;;  %v192_v60 = vmul.f32 %v190_v57, %v794_v0  ;;  %v202_v61 = vsel %vm201_vm0, %v197_v28, 0.0  ;;  %555 = sst [smem:[#allocation5 + $0x6]] %s736_s11 }
   0xa   :  { %70 = vmatmul.f32.vlgmr.msra.gmra.mxu0 %v806_v3  ;;  %v642_v15 = vld [vmem:[%s913_s4 + $0x10] sm:$0xff]  ;;  %v641_v17 = vld [vmem:[%s913_s4 + $0x8] sm:$0xff]  ;;  %v640_v19 = vld [vmem:[%s913_s4] sm:$0xff]  ;;  %v255_v24 = vsel %vm201_vm0, %v251_v23, 0.0  ;;  %v252_v25 = vsel %vm193_vm1, %v251_v23, 0.0  ;;  %s574_s4 = sld [smem:[#allocation2 + $0x1]]  ;;  %199 = vadd.xlane.f32.xlu2 %v198_v31  ;;  %vm82_vm2 = vcmp.eq.s32.totalorder %v79_v33, %v81_v34 }
   0xb   :  { %366 = vmatpush.bf16.msra.mxu1 %v646_v4  ;;  %v650_v16 = vld [vmem:[%s915_s6 + $0x10] sm:$0xff]  ;;  %v649_v18 = vld [vmem:[%s915_s6 + $0x8] sm:$0xff]  ;;  %v648_v20 = vld [vmem:[%s915_s6] sm:$0xff]  ;;  %256 = vadd.xlane.f32.xlu1 %v255_v24  ;;  %v864_v38 = vsel %vm82_vm2, 1.0, %v734_v37  ;;  %v194_v63 = vsel %vm193_vm1, %v192_v60, 0.0  ;;  %557 = sst [smem:[#allocation5 + $0x7]] %s736_s11 }
   0xc   :  { %448 = vmatpush.bf16.msra.mxu2 %v654_v5  ;;  %v47_v8 = vstv %s46_s8  ;;  %v296_v21 = vld [vmem:[%s911_s2] sm:$0xf]  ;;  %s733_s2 = smov 124   ;;  %s563_s20 = sshll.u32 %s918_s9, 4  ;;  %s564_s20 = int_to_ptr.vmem [resolvable:$true] %s563_s20 }
   0xd   :  { %v48_v9 = vmul.f32 1.442695, %v47_v8  ;;  %v378_v22 = vld [vmem:[%s912_s3] sm:$0xf]  ;;  %s737_s22 = smov [#allocation5]  }
   0xe   :  { %v678_v43 = vld [vmem:[%s914_s5] ss:$0 sm:$0xff] }
   0xf   :  { %680 = vpow2.f32 %v48_v9  ;;  %367 = vmatpush.bf16.msra.mxu1 %v645_v6  ;;  %v679_v47 = vld [vmem:[%s916_s7] ss:$0 sm:$0xff] }
  0x10   :  { %449 = vmatpush.bf16.msra.mxu2 %v653_v7  ;;  %v76_v30 = vstv %s574_s4  ;;  %v245_v7 = vrot.slane %v806_v3, 4 }
  0x13   :  { %368 = vmatpush.bf16.msra.mxu1 %v644_v10  ;;  %253 = vadd.xlane.f32.xlu1 %v252_v25 }
  0x14   :  { %450 = vmatpush.bf16.msra.mxu2 %v652_v11  ;;  %v247_v11 = vmul.f32 %v245_v7, %v806_v3 }
  0x15   :  { %v681_v14 = vpop.eup %680 }
  0x16   :  { %656 = vpush %v681_v14 }
  0x17   :  { %369 = vmatpush.bf16.msra.mxu1 %v643_v12 }
  0x18   :  { %451 = vmatpush.bf16.msra.mxu2 %v651_v13 }
  0x1b   :  { %370 = vmatpush.bf16.msra.mxu1 %v642_v15  ;;  %v248_v15 = vsel %vm193_vm1, %v247_v11, 0.0 }
  0x1c   :  { %452 = vmatpush.bf16.msra.mxu2 %v650_v16 }
  0x1f   :  { %371 = vmatpush.bf16.msra.mxu1 %v641_v17 }
  0x20   :  { %453 = vmatpush.bf16.msra.mxu2 %v649_v18 }
  0x23   :  { %372 = vmatpush.bf16.msra.mxu1 %v640_v19 }
  0x24   :  { %454 = vmatpush.bf16.msra.mxu2 %v648_v20 }
  0x26   :  { %373 = vmatmul.bf16.vlgmr.msra.gmra.mxu1 %v296_v21 }
  0x27   :  { %455 = vmatmul.bf16.vlgmr.msra.gmra.mxu2 %v378_v22 }
  0x47   :  { %s657_s6 = spop %656 }
  0x48   :  { %v74_v26 = vstv %s657_s6 }
  0x7e   :  { %v257_v27 = vpop.xlane.xlu1 %256 }
  0x86   :  { %v254_v34 = vpop.xlane.xlu1 %253 }
  0x87   :  { %v71_v29 = vpop.f32.mrf.mxu0 }
  0x88   :  { %v75_v32 = vmul.f32 %v74_v26, %v71_v29 }
  0x8a   :  { %v77_v35 = vadd.f32 %v76_v30, %v75_v32  ;;  %v259_v32 = vrot.slane %v257_v27, 4 }
  0x8c   :  { %v86_v36 = vrot.slane %v77_v35, 4  ;;  %v84_v39 = vmul.f32 %v864_v38, %v77_v35 }
  0x8e   :  { %87 = vrot.lane.b32.xlu0 %v86_v36, %s733_s2  ;;  %v91_v40 = vsub.f32 0.0, %v84_v39  ;;  %v575_v19 = vmul.f32 -1.442695, %v84_v39  ;;  %v261_v36 = vmul.f32 %v259_v32, %v254_v34  ;;  %v200_v39 = vpop.xlane.xlu2 %199 }
  0x90   :  { %v95_v41 = vand.u32 2147483647, %v91_v40  ;;  %v92_v13 = vmax.f32 %v91_v40, 0.0  ;;  %vm93_vm4 = vcmp.ne.f32.partialorder %v91_v40, %v91_v40 }
  0x92   :  { %v96_v42 = vsub.f32 0.0, %v95_v41 }
  0x94   :  { %v97_v44 = vmul.f32 1.442695, %v96_v42  ;;  %v262_v42 = vmax.f32 %v261_v36, 1e-16 }
  0x96   :  { %682 = vpow2.f32 %v97_v44  ;;  %vm269_vm12 = vweird.f32 %v262_v42 }
  0x9c   :  { %v683_v53 = vpop.eup %682 }
  0x9d   :  { %v99_v58 = vadd.f32 1.0, %v683_v53  ;;  %v102_v1 = vmul.f32 -0.5, %v683_v53  ;;  %v105_v6 = vand.u32 2147483647, %v683_v53 }
  0x9f   :  { %684 = vlog2.f32 %v99_v58  ;;  %v103_v5 = vadd.f32 1.0, %v102_v1  ;;  %vm106_vm3 = vcmp.lt.f32.partialorder %v105_v6, 0.0004427343 }
  0xa0   :  { %686 = vpow2.f32 %v575_v19 }
  0xa1   :  { %v104_v9 = vmul.f32 %v683_v53, %v103_v5 }
  0xa3   :  { %v374_v45 = vpop.f32.mrf.mxu1 }
  0xa4   :  { %v375_v46 = vadd.f32 %v678_v43, %v374_v45 }
  0xa5   :  { %v685_v2 = vpop.eup %684 }
  0xa6   :  { %v464_v48 = vmul.f32 %v375_v46, %v375_v46  ;;  %v101_v8 = vmul.f32 0.6931472, %v685_v2  ;;  %v687_v21 = vpop.eup %686 }
  0xa7   :  { %v137_v23 = vadd.f32 1.0, %v687_v21 }
  0xa8   :  { %v510_v49 = vsel %vm201_vm0, %v464_v48, 0.0  ;;  %v465_v62 = vsel %vm193_vm1, %v464_v48, 0.0  ;;  %v107_v12 = vsel %vm106_vm3, %v104_v9, %v101_v8 }
  0xa9   :  { %511 = vadd.xlane.f32.xlu1 %v510_v49  ;;  %v108_v14 = vadd.f32 %v107_v12, %v92_v13  ;;  %688 = vrcp.f32 %v137_v23  ;;  %v149_v49 = vand.u32 2147483648, %v137_v23  ;;  %vm143_vm8 = vweird.f32 %v137_v23 }
  0xaa   :  { %v456_v50 = vpop.f32.mrf.mxu2 }
  0xab   :  { %v457_v51 = vadd.f32 %v679_v47, %v456_v50  ;;  %v376_v52 = vpop.f32.mrf.mxu1  ;;  %v109_v16 = vsel %vm93_vm4, %v91_v40, %v108_v14  ;;  %v147_v50 = vand.u32 2147483647, %v137_v23 }
  0xac   :  { %v110_v17 = vsub.f32 0.0, %v109_v16 }
  0xad   :  { %v468_v54 = vmul.f32 %v457_v51, %v457_v51  ;;  %v460_v4 = vmul.f32 %v457_v51, %v375_v46  ;;  %vm148_vm11 = vcmp.eq.f32.partialorder %v147_v50, 8.507059e+37 }
  0xae   :  { %v112_v18 = vsel %vm111_vm5, %v110_v17, 0.0 }
  0xaf   :  { %v513_v55 = vsel %vm201_vm0, %v468_v54, 0.0  ;;  %v469_v56 = vsel %vm193_vm1, %v468_v54, 0.0  ;;  %v507_v0 = vsel %vm201_vm0, %v460_v4, 0.0  ;;  %v461_v10 = vsel %vm193_vm1, %v460_v4, 0.0  ;;  %v689_v28 = vpop.eup %688 }
  0xb0   :  { %514 = vadd.xlane.f32.xlu2 %v513_v55  ;;  %v139_v30 = vmul.f32 %v689_v28, %v137_v23  ;;  %vm144_vm7 = vweird.f32 %v689_v28  ;;  %v150_v55 = vor.u32 1.1754944e-38, %v149_v49  ;;  %vm222_vm1 = vcmask 3072  }
  0xb1   :  { %470 = vadd.xlane.f32.xlu1 %v469_v56  ;;  %vm145_vm10 = vmor %vm143_vm8, %vm144_vm7 }
  0xb2   :  { %v458_v59 = vpop.f32.mrf.mxu2  ;;  %v140_v35 = vsub.f32 1.0, %v139_v30 }
  0xb4   :  { %v141_v40 = vmul.f32 %v689_v28, %v140_v35 }
  0xb6   :  { %v142_v47 = vadd.f32 %v689_v28, %v141_v40 }
  0xb8   :  { %203 = vadd.xlane.f32.xlu0 %v202_v61  ;;  %466 = vadd.xlane.f32.xlu2 %v465_v62  ;;  %v146_v53 = vsel %vm145_vm10, %v689_v28, %v142_v47 }
  0xb9   :  { %195 = vadd.xlane.f32.xlu1 %v194_v63  ;;  %v151_v60 = vsel %vm148_vm11, %v150_v55, %v146_v53 }
  0xc0   :  { %508 = vadd.xlane.f32.xlu2 %v507_v0 }
  0xc1   :  { %462 = vadd.xlane.f32.xlu1 %v461_v10 }
  0xc8   :  { %249 = vadd.xlane.f32.xlu2 %v248_v15 }
  0xd0   :  { %113 = vadd.xlane.f32.xlu2 %v112_v18  ;;  %v735_v18 = vmov 4.0  }
 0x100   :  { %v88_v20 = vpop.permute.xlu0 %87 }
 0x101   :  { %v90_v3 = vmul.f32 %v88_v20, %v864_v38 }
 0x103   :  { %v153_v22 = vsub.f32 0.0, %v90_v3 }
 0x105   :  { %v157_v24 = vand.u32 2147483647, %v153_v22  ;;  %v154_v45 = vmax.f32 %v153_v22, 0.0  ;;  %vm155_vm9 = vcmp.ne.f32.partialorder %v153_v22, %v153_v22 }
 0x107   :  { %v158_v25 = vsub.f32 0.0, %v157_v24 }
 0x109   :  { %v159_v26 = vmul.f32 1.442695, %v158_v25 }
 0x10b   :  { %690 = vpow2.f32 %v159_v26 }
 0x111   :  { %v691_v29 = vpop.eup %690 }
 0x112   :  { %v161_v31 = vadd.f32 1.0, %v691_v29  ;;  %v164_v33 = vmul.f32 -0.5, %v691_v29  ;;  %v167_v38 = vand.u32 2147483647, %v691_v29 }
 0x114   :  { %692 = vlog2.f32 %v161_v31  ;;  %v165_v37 = vadd.f32 1.0, %v164_v33  ;;  %vm168_vm6 = vcmp.lt.f32.partialorder %v167_v38, 0.0004427343 }
 0x115   :  { %694 = vrsqrt.f32 %v262_v42 }
 0x116   :  { %v166_v44 = vmul.f32 %v691_v29, %v165_v37 }
 0x11a   :  { %v693_v41 = vpop.eup %692 }
 0x11b   :  { %v163_v43 = vmul.f32 0.6931472, %v693_v41  ;;  %v695_v58 = vpop.eup %694 }
 0x11c   :  { %v512_v51 = vpop.xlane.xlu1 %511  ;;  %v264_v63 = vmul.f32 %v695_v58, %v262_v42  ;;  %vm270_vm13 = vweird.f32 %v695_v58 }
 0x11d   :  { %v169_v46 = vsel %vm168_vm6, %v166_v44, %v163_v43  ;;  %vm271_vm14 = vmor %vm269_vm12, %vm270_vm13 }
 0x11e   :  { %v170_v48 = vadd.f32 %v169_v46, %v154_v45  ;;  %v265_v4 = vmul.f32 %v695_v58, %v264_v63 }
 0x120   :  { %v171_v52 = vsel %vm155_vm9, %v153_v22, %v170_v48  ;;  %v266_v11 = vmul.f32 0.5, %v265_v4 }
 0x121   :  { %v172_v54 = vsub.f32 0.0, %v171_v52 }
 0x122   :  { %v267_v16 = vsub.f32 1.5, %v266_v11 }
 0x123   :  { %v515_v56 = vpop.xlane.xlu2 %514  ;;  %v173_v57 = vsub.f32 %v110_v17, %v172_v54 }
 0x124   :  { %v516_v59 = vmul.f32 %v515_v56, %v512_v51  ;;  %v471_v2 = vpop.xlane.xlu1 %470  ;;  %v268_v3 = vmul.f32 %v695_v58, %v267_v16 }
 0x125   :  { %v174_v61 = vmul.f32 %v173_v57, %v151_v60 }
 0x126   :  { %v517_v62 = vmax.f32 %v516_v59, 1e-16  ;;  %v272_v29 = vsel %vm271_vm14, %v695_v58, %v268_v3 }
 0x127   :  { %v175_v1 = vsel %vm111_vm5, %v174_v61, 0.0 }
 0x128   :  { %696 = vrsqrt.f32 %v517_v62  ;;  %176 = vadd.xlane.f32.xlu1 %v175_v1  ;;  %vm524_vm15 = vweird.f32 %v517_v62 }
 0x12b   :  { %v204_v5 = vpop.xlane.xlu0 %203  ;;  %v467_v6 = vpop.xlane.xlu2 %466 }
 0x12c   :  { %v206_v7 = vrot.slane %v204_v5, 4  ;;  %v472_v8 = vmul.f32 %v471_v2, %v467_v6  ;;  %v196_v21 = vpop.xlane.xlu1 %195 }
 0x12e   :  { %v697_v0 = vpop.eup %696  ;;  %v208_v9 = vmul.f32 %v206_v7, %v200_v39  ;;  %v473_v10 = vmax.f32 %v472_v8, 1e-16 }
 0x12f   :  { %v519_v12 = vmul.f32 %v697_v0, %v517_v62  ;;  %vm525_vm0 = vweird.f32 %v697_v0 }
 0x130   :  { %v209_v13 = vmax.f32 %v208_v9, 1e-16  ;;  %698 = vrsqrt.f32 %v473_v10  ;;  %vm889_vm4 = vmor %vm524_vm15, %vm525_vm0  ;;  %vm480_vm5 = vweird.f32 %v473_v10 }
 0x131   :  { %v520_v14 = vmul.f32 %v697_v0, %v519_v12 }
 0x132   :  { %700 = vrsqrt.f32 %v209_v13  ;;  %vm216_vm7 = vweird.f32 %v209_v13 }
 0x133   :  { %v509_v15 = vpop.xlane.xlu2 %508  ;;  %v521_v17 = vmul.f32 0.5, %v520_v14  ;;  %702 = vrcp.f32 %v735_v18 }
 0x134   :  { %v463_v44 = vpop.xlane.xlu1 %462 }
 0x135   :  { %v522_v25 = vsub.f32 1.5, %v521_v17 }
 0x136   :  { %v699_v19 = vpop.eup %698 }
 0x137   :  { %v475_v20 = vmul.f32 %v699_v19, %v473_v10  ;;  %v523_v33 = vmul.f32 %v697_v0, %v522_v25  ;;  %vm481_vm2 = vweird.f32 %v699_v19 }
 0x138   :  { %v701_v22 = vpop.eup %700  ;;  %vm482_vm6 = vmor %vm480_vm5, %vm481_vm2 }
 0x139   :  { %v211_v23 = vmul.f32 %v701_v22, %v209_v13  ;;  %v476_v24 = vmul.f32 %v699_v19, %v475_v20  ;;  %v703_v26 = vpop.eup %702  ;;  %vm217_vm3 = vweird.f32 %v701_v22  ;;  %v527_v42 = vsel %vm889_vm4, %v697_v0, %v523_v33 }
 0x13a   :  { %v124_v36 = vmul.f32 4.0, %v703_v26  ;;  %vm218_vm8 = vmor %vm216_vm7, %vm217_vm3  ;;  %v528_v50 = vmul.f32 %v527_v42, %v509_v15  ;;  %vm128_vm9 = vweird.f32 %v703_v26 }
 0x13b   :  { %v477_v27 = vmul.f32 0.5, %v476_v24  ;;  %v212_v28 = vmul.f32 %v701_v22, %v211_v23  ;;  %v250_v30 = vpop.xlane.xlu2 %249 }
 0x13c   :  { %v273_v31 = vmul.f32 %v272_v29, %v250_v30  ;;  %v125_v46 = vsub.f32 1.0, %v124_v36  ;;  %v529_v57 = vsub.f32 1.0, %v528_v50 }
 0x13d   :  { %v213_v32 = vmul.f32 0.5, %v212_v28  ;;  %v478_v34 = vsub.f32 1.5, %v477_v27 }
 0x13e   :  { %v274_v35 = vsub.f32 1.0, %v273_v31  ;;  %v126_v56 = vmul.f32 %v703_v26, %v125_v46  ;;  %v531_v62 = vrot.slane %v529_v57, 4 }
 0x13f   :  { %v214_v37 = vsub.f32 1.5, %v213_v32  ;;  %v479_v39 = vmul.f32 %v699_v19, %v478_v34 }
 0x140   :  { %v275_v40 = vsel %vm222_vm1, %v274_v35, 0.0  ;;  %v127_v61 = vadd.f32 %v703_v26, %v126_v56  ;;  %v533_v4 = vsel %vm222_vm1, %v531_v62, 0.0 }
 0x141   :  { %v215_v41 = vmul.f32 %v701_v22, %v214_v37  ;;  %v483_v43 = vsel %vm482_vm6, %v699_v19, %v479_v39  ;;  %276 = vadd.xlane.f32.xlu0 %v275_v40 }
 0x142   :  { %v484_v45 = vmul.f32 %v483_v43, %v463_v44  ;;  %v129_v2 = vsel %vm128_vm9, %v703_v26, %v127_v61 }
 0x143   :  { %v219_v47 = vsel %vm218_vm8, %v701_v22, %v215_v41  ;;  %v114_v48 = vpop.xlane.xlu2 %113 }
 0x144   :  { %v220_v49 = vmul.f32 %v219_v47, %v196_v21  ;;  %v485_v51 = vsub.f32 1.0, %v484_v45  ;;  %v115_v52 = vrot.slane %v114_v48, 4 }
 0x146   :  { %v221_v53 = vsub.f32 1.0, %v220_v49  ;;  %v116_v54 = vadd.f32 %v115_v52, %v114_v48  ;;  %v486_v55 = vsel %vm222_vm1, %v485_v51, 0.0 }
 0x147   :  { %487 = vadd.xlane.f32.xlu1 %v486_v55 }
 0x148   :  { %v117_v58 = vrot.slane %v116_v54, 2  ;;  %v223_v59 = vsel %vm222_vm1, %v221_v53, 0.0 }
 0x149   :  { %224 = vadd.xlane.f32.xlu2 %v223_v59 }
 0x14a   :  { %v118_v60 = vadd.f32 %v117_v58, %v116_v54 }
 0x14c   :  { %v119_v63 = vrot.slane %v118_v60, 1 }
 0x14e   :  { %v120_v1 = vadd.f32 %v119_v63, %v118_v60 }
 0x150   :  { %658 = vpush %v120_v1 }
 0x151   :  { %534 = vadd.xlane.f32.xlu2 %v533_v4  ;;  %660 = vpush %v129_v2 }
 0x181   :  { %s659_s5 = spop %658 }
 0x182   :  { %s122_s7 = ssub.f32 0.0, %s659_s5  ;;  %s899_s30 = spop %660 }
 0x184   :  { %s131_s10 = smul.f32 %s899_s30, %s122_s7 }
 0x186   :  { %133 = sst [smem:[#allocation5]] %s131_s10 }
 0x19b   :  { %v177_v5 = vpop.xlane.xlu1 %176 }
 0x19c   :  { %v178_v6 = vrot.slane %v177_v5, 4 }
 0x19e   :  { %v179_v7 = vadd.f32 %v178_v6, %v177_v5 }
 0x1a0   :  { %v180_v8 = vrot.slane %v179_v7, 2 }
 0x1a2   :  { %v181_v0 = vadd.f32 %v180_v8, %v179_v7 }
 0x1a4   :  { %v182_v9 = vrot.slane %v181_v0, 1 }
 0x1a6   :  { %v183_v10 = vadd.f32 %v182_v9, %v181_v0 }
 0x1a8   :  { %662 = vpush %v183_v10 }
 0x1b4   :  { %v277_v11 = vpop.xlane.xlu0 %276 }
 0x1b5   :  { %v278_v12 = vrot.slane %v277_v11, 4 }
 0x1b7   :  { %v279_v13 = vadd.f32 %v278_v12, %v277_v11 }
 0x1b9   :  { %v280_v16 = vrot.slane %v279_v13, 2 }
 0x1ba   :  { %v488_v14 = vpop.xlane.xlu1 %487 }
 0x1bb   :  { %v489_v15 = vrot.slane %v488_v14, 4  ;;  %v281_v3 = vadd.f32 %v280_v16, %v279_v13 }
 0x1bc   :  { %v225_v17 = vpop.xlane.xlu2 %224 }
 0x1bd   :  { %v490_v18 = vadd.f32 %v489_v15, %v488_v14  ;;  %v226_v19 = vrot.slane %v225_v17, 4  ;;  %v282_v26 = vrot.slane %v281_v3, 1 }
 0x1bf   :  { %v491_v20 = vrot.slane %v490_v18, 2  ;;  %v227_v21 = vadd.f32 %v226_v19, %v225_v17  ;;  %v283_v32 = vadd.f32 %v282_v26, %v281_v3 }
 0x1c1   :  { %v492_v22 = vadd.f32 %v491_v20, %v490_v18  ;;  %v228_v23 = vrot.slane %v227_v21, 2 }
 0x1c3   :  { %v229_v24 = vadd.f32 %v228_v23, %v227_v21  ;;  %v493_v29 = vrot.slane %v492_v22, 1 }
 0x1c4   :  { %v535_v25 = vpop.xlane.xlu2 %534 }
 0x1c5   :  { %v536_v27 = vrot.slane %v535_v25, 4  ;;  %v230_v28 = vrot.slane %v229_v24, 1  ;;  %v494_v34 = vadd.f32 %v493_v29, %v492_v22 }
 0x1c7   :  { %v537_v30 = vadd.f32 %v536_v27, %v535_v25  ;;  %v231_v31 = vadd.f32 %v230_v28, %v229_v24 }
 0x1c9   :  { %v538_v33 = vrot.slane %v537_v30, 2  ;;  %664 = vpush %v231_v31 }
 0x1ca   :  { %666 = vpush %v283_v32 }
 0x1cb   :  { %v539_v35 = vadd.f32 %v538_v33, %v537_v30  ;;  %668 = vpush %v494_v34 }
 0x1cd   :  { %v540_v36 = vrot.slane %v539_v35, 1 }
 0x1cf   :  { %v541_v37 = vadd.f32 %v540_v36, %v539_v35 }
 0x1d1   :  { %670 = vpush %v541_v37 }
 0x1d9   :  { %s663_s12 = spop %662 }
 0x1da   :  { %186 = sst [smem:[#allocation5 + $0x1]] %s663_s12 }
 0x1fa   :  { %s665_s13 = spop %664 }
 0x1fb   :  { %s241_s14 = smul.f32 %s665_s13, %s899_s30  ;;  %s667_s15 = spop %666 }
 0x1fc   :  { %s293_s16 = smul.f32 %s667_s15, %s899_s30  ;;  %s669_s17 = spop %668 }
 0x1fd   :  { %243 = sst [smem:[#allocation5 + $0x2]] %s241_s14  ;;  %s504_s18 = smul.f32 %s669_s17, %s899_s30 }
 0x1fe   :  { %295 = sst [smem:[#allocation5 + $0x3]] %s293_s16 }
 0x1ff   :  { %506 = sst [smem:[#allocation5 + $0x4]] %s504_s18 }
 0x202   :  { %s671_s1 = spop %670 }
 0x203   :  { %s551_s21 = smul.f32 %s671_s1, %s899_s30 }
 0x205   :  { %553 = sst [smem:[#allocation5 + $0x5]] %s551_s21 }
 0x206   :  { %566 = dma.smem_to_vmem %s737_s22, 16, %s564_s20, [#allocation4]  }
 0x207   :  { %730 = dma.done.wait [#allocation4], 16  }
 0x208   :  { %731 = vsyncadd [#allocation4], 4294967280 }
 0x209   :  { %571 = sfence }
 0x20a   :  { %572 = vsyncpa [#allocation3], 1 }
 0x20b   :  { %573 = vsyncpa [#allocation4], 1 }

// kernel: dlip_pretrain_sigmoid_forward.19
= control target key start
LH: loop header
LB: loop body
LE: loop exit
PB: predicated region body
PF: predicated region fallthrough
CT: control target
= control target key end

     0   :  { %v794_v5 = vmov 0   ;;  %s1180_s0 = inlined_call_operand.vmem [shape: f32[32,256], index: 0, kind: input, shape index: {}]   ;;  %s1181_s1 = inlined_call_operand.vmem [shape: f32[32,256], index: 1, kind: input, shape index: {}]   ;;  %s1182_s2 = inlined_call_operand.vmem [shape: s32[32,1], index: 2, kind: input, shape index: {}]   ;;  %s1183_s3 = inlined_call_operand.vmem [shape: f32[32,1], index: 3, kind: input, shape index: {}]   ;;  %s1184_s4 = inlined_call_operand.vmem [shape: f32[8,128], index: 4, kind: input, shape index: {}]   ;;  %s1185_s5 = inlined_call_operand.vmem [shape: f32[8,128], index: 5, kind: input, shape index: {}]   ;;  %s1186_s6 = inlined_call_operand.vmem [shape: f32[5,128], index: 6, kind: input, shape index: {}]   ;;  %s1187_s7 = inlined_call_operand.vmem [shape: f32[5,128], index: 7, kind: input, shape index: {}]   ;;  %s1188_s8 = inlined_call_operand.vmem [shape: f32[8,128], index: 8, kind: input, shape index: {}]   ;;  %s1189_s9 = inlined_call_operand.vmem [shape: f32[8,128], index: 9, kind: input, shape index: {}]   ;;  %s1190_s10 = inlined_call_operand.vmem [shape: f32[1,8], index: 10, kind: output, shape index: {}]  }
   0x1   :  { %v40_v0 = vld [vmem:[%s1180_s0 + $0x20] sm:$0xff]  ;;  %v41_v1 = vld [vmem:[%s1180_s0 + $0x28] sm:$0xff]  ;;  %677 = vset.pattern.permute.xlu1 %v794_v5  ;;  %679 = vset.pattern.permute.xlu0 %v794_v5 }
   0x2   :  { %v36_v2 = vld [vmem:[%s1180_s0] sm:$0xff]  ;;  %v66_v3 = vmax.f32 %v40_v0, %v41_v1  ;;  %v37_v4 = vld [vmem:[%s1180_s0 + $0x8] sm:$0xff]  ;;  %678 = vset.pattern.permute.xlu2 %v794_v5 }
   0x3   :  { %v60_v6 = vmax.f32 %v36_v2, %v37_v4 }
   0x4   :  { %67 = vmax.xlane.f32.xlu1 %v66_v3 }
   0x5   :  { %15 = vsyncpa [#allocation3], 0  ;;  %61 = vmax.xlane.f32.xlu0 %v60_v6  ;;  %v42_v7 = vld [vmem:[%s1180_s0 + $0x30] sm:$0xff]  ;;  %v43_v8 = vld [vmem:[%s1180_s0 + $0x38] sm:$0xff]  ;;  %vm267_vm10 = vcmask 7168   ;;  %vm488_vm13 = vcmask 1044480  }
   0x6   :  { %v38_v9 = vld [vmem:[%s1180_s0 + $0x10] sm:$0xff]  ;;  %v39_v10 = vld [vmem:[%s1180_s0 + $0x18] sm:$0xff]  ;;  %v69_v11 = vmax.f32 %v42_v7, %v43_v8  ;;  %v894_v16 = vld [vmem:[%s1182_s2] sm:$0xff]  ;;  %s797_s28 = smov 0.0   ;;  %s629_s13 = sshll.u32 %s1190_s10, 4  ;;  %s630_s13 = int_to_ptr.vmem [resolvable:$true] %s629_s13 }
   0x7   :  { %v63_v12 = vmax.f32 %v38_v9, %v39_v10  ;;  %v882_v13 = vld [vmem:[%s1181_s1 + $0x10] sm:$0xff]  ;;  %v887_v14 = vld [vmem:[%s1181_s1 + $0x18] sm:$0xff]  ;;  %v900_v17 = vld [vmem:[%s1181_s1] sm:$0xff]  ;;  %vm227_vm8 = vcmp.ne.s32.totalorder %v894_v16, 4294967196  ;;  %619 = sst [smem:[#allocation2 + $0x5]] %s797_s28  ;;  %s799_s21 = smov [#allocation2]  }
   0x8   :  { %v127_v15 = vmax.f32 %v882_v13, %v887_v14  ;;  %v905_v18 = vld [vmem:[%s1181_s1 + $0x8] sm:$0xff]  ;;  %v910_v19 = vld [vmem:[%s1181_s1 + $0x20] sm:$0xff]  ;;  %v948_v55 = vld [vmem:[%s1182_s2 + $0x10] sm:$0xff]  ;;  %621 = sst [smem:[#allocation2 + $0x6]] %s797_s28 }
   0x9   :  { %v124_v20 = vmax.f32 %v900_v17, %v905_v18  ;;  %v917_v21 = vld [vmem:[%s1181_s1 + $0x28] sm:$0xff]  ;;  %v954_v56 = vld [vmem:[%s1182_s2 + $0x18] sm:$0xff]  ;;  %v974_v63 = vld [vmem:[%s1181_s1 + $0x30] sm:$0xff]  ;;  %vm229_vm11 = vcmp.ne.s32.totalorder %v948_v55, 4294967196  ;;  %623 = sst [smem:[#allocation2 + $0x7]] %s797_s28 }
   0xa   :  { %v130_v22 = vmax.f32 %v910_v19, %v917_v21  ;;  %v959_v57 = vld [vmem:[%s1182_s2 + $0x8] sm:$0xff]  ;;  %vm230_vm12 = vcmp.ne.s32.totalorder %v954_v56, 4294967196 }
   0xb   :  { %125 = vmax.xlane.f32.xlu2 %v124_v20  ;;  %vm228_vm9 = vcmp.ne.s32.totalorder %v959_v57, 4294967196 }
   0xc   :  { %70 = vmax.xlane.f32.xlu1 %v69_v11 }
   0xd   :  { %64 = vmax.xlane.f32.xlu0 %v63_v12 }
  0x15   :  { %128 = vmax.xlane.f32.xlu0 %v127_v15 }
  0x1d   :  { %131 = vmax.xlane.f32.xlu0 %v130_v22 }
  0x25   :  { %192 = vperm.xlu1 %677, %v894_v16  }
  0x77   :  { %v68_v23 = vpop.xlane.xlu1 %67 }
  0x78   :  { %v921_v24 = vsub.f32 %v40_v0, %v68_v23  ;;  %v923_v25 = vsub.f32 %v41_v1, %v68_v23  ;;  %v62_v26 = vpop.xlane.xlu0 %61  ;;  %v979_v0 = vld [vmem:[%s1181_s1 + $0x38] sm:$0xff] }
  0x79   :  { %v925_v27 = vsub.f32 %v36_v2, %v62_v26  ;;  %v927_v28 = vsub.f32 %v37_v4, %v62_v26  ;;  %v133_v1 = vmax.f32 %v974_v63, %v979_v0 }
  0x7a   :  { %v88_v29 = vmul.f32 1.442695, %v921_v24  ;;  %v90_v30 = vmul.f32 1.442695, %v923_v25 }
  0x7b   :  { %v80_v31 = vmul.f32 1.442695, %v925_v27  ;;  %v82_v32 = vmul.f32 1.442695, %v927_v28 }
  0x7c   :  { %680 = vpow2.f32 %v88_v29 }
  0x7d   :  { %682 = vpow2.f32 %v90_v30 }
  0x7e   :  { %684 = vpow2.f32 %v80_v31  ;;  %v126_v5 = vpop.xlane.xlu2 %125  ;;  %v795_v31 = vmov 0.0  }
  0x7f   :  { %686 = vpow2.f32 %v82_v32  ;;  %v71_v33 = vpop.xlane.xlu1 %70  ;;  %v986_v11 = vsub.f32 %v900_v17, %v126_v5 }
  0x80   :  { %v933_v34 = vsub.f32 %v42_v7, %v71_v33  ;;  %v935_v35 = vsub.f32 %v43_v8, %v71_v33  ;;  %v65_v36 = vpop.xlane.xlu0 %64  ;;  %v188_v7 = vlaneseq }
  0x81   :  { %v937_v37 = vsub.f32 %v38_v9, %v65_v36  ;;  %v939_v38 = vsub.f32 %v39_v10, %v65_v36  ;;  %v144_v22 = vmul.f32 1.442695, %v986_v11 }
  0x82   :  { %v681_v39 = vpop.eup %680  ;;  %v92_v40 = vmul.f32 1.442695, %v933_v34  ;;  %v94_v41 = vmul.f32 1.442695, %v935_v35  ;;  %v983_v8 = vand.u32 127, %v188_v7 }
  0x83   :  { %v683_v42 = vpop.eup %682  ;;  %v84_v43 = vmul.f32 1.442695, %v937_v37  ;;  %v86_v44 = vmul.f32 1.442695, %v939_v38 }
  0x84   :  { %v685_v45 = vpop.eup %684  ;;  %688 = vpow2.f32 %v92_v40  ;;  %v102_v46 = vadd.f32 %v683_v42, %v681_v39  ;;  %v989_v12 = vadd.s32 128, %v983_v8 }
  0x85   :  { %v687_v47 = vpop.eup %686  ;;  %690 = vpow2.f32 %v94_v41 }
  0x86   :  { %692 = vpow2.f32 %v84_v43  ;;  %103 = vadd.xlane.f32.xlu0 %v102_v46  ;;  %v96_v48 = vadd.f32 %v687_v47, %v685_v45 }
  0x87   :  { %694 = vpow2.f32 %v86_v44 }
  0x88   :  { %97 = vadd.xlane.f32.xlu2 %v96_v48  ;;  %v129_v58 = vpop.xlane.xlu0 %128 }
  0x89   :  { %v964_v59 = vsub.f32 %v882_v13, %v129_v58  ;;  %v967_v60 = vsub.f32 %v887_v14, %v129_v58  ;;  %v992_v14 = vsub.f32 %v905_v18, %v126_v5 }
  0x8a   :  { %v689_v49 = vpop.eup %688 }
  0x8b   :  { %v691_v50 = vpop.eup %690  ;;  %v148_v61 = vmul.f32 1.442695, %v964_v59  ;;  %v150_v62 = vmul.f32 1.442695, %v967_v60  ;;  %v146_v29 = vmul.f32 1.442695, %v992_v14 }
  0x8c   :  { %v693_v51 = vpop.eup %692  ;;  %v105_v52 = vadd.f32 %v691_v50, %v689_v49 }
  0x8d   :  { %v695_v53 = vpop.eup %694  ;;  %696 = vpow2.f32 %v148_v61 }
  0x8e   :  { %106 = vadd.xlane.f32.xlu1 %v105_v52  ;;  %v99_v54 = vadd.f32 %v695_v53, %v693_v51  ;;  %698 = vpow2.f32 %v150_v62 }
  0x90   :  { %100 = vadd.xlane.f32.xlu2 %v99_v54  ;;  %v132_v6 = vpop.xlane.xlu0 %131 }
  0x91   :  { %v995_v20 = vsub.f32 %v910_v19, %v132_v6  ;;  %v1000_v23 = vsub.f32 %v917_v21, %v132_v6 }
  0x93   :  { %v697_v2 = vpop.eup %696  ;;  %v152_v30 = vmul.f32 1.442695, %v995_v20  ;;  %v154_v36 = vmul.f32 1.442695, %v1000_v23 }
  0x94   :  { %v699_v3 = vpop.eup %698 }
  0x95   :  { %v163_v4 = vadd.f32 %v699_v3, %v697_v2 }
  0x97   :  { %v193_v13 = vpop.permute.xlu1 %192 }
  0x98   :  { %vm203_vm0 = vcmp.eq.s32.totalorder %v983_v8, %v193_v13  ;;  %vm204_vm1 = vcmp.eq.s32.totalorder %v989_v12, %v193_v13 }
  0x99   :  { %v639_v32 = vsel %vm203_vm0, 1.0, %v795_v31  ;;  %v640_v21 = vsel %vm204_vm1, 1.0, %v795_v31 }
  0x9a   :  { %198 = vperm.xlu0 %679, %v948_v55  }
  0xa7   :  { %201 = vperm.xlu1 %677, %v954_v56  }
  0xa8   :  { %195 = vperm.xlu2 %678, %v959_v57   ;;  %v650_v57 = vsel %vm230_vm12, 1.0, %v795_v31 }
  0xd1   :  { %134 = vmax.xlane.f32.xlu2 %v133_v1 }
  0xd9   :  { %164 = vadd.xlane.f32.xlu2 %v163_v4 }
  0xf9   :  { %v104_v10 = vpop.xlane.xlu0 %103 }
  0xfb   :  { %v98_v9 = vpop.xlane.xlu2 %97 }
  0xfc   :  { %700 = vlog2.f32 %v98_v9 }
  0xfd   :  { %702 = vlog2.f32 %v104_v10 }
 0x102   :  { %v701_v15 = vpop.eup %700 }
 0x103   :  { %v109_v17 = vmul.f32 0.6931472, %v701_v15  ;;  %v101_v26 = vpop.xlane.xlu2 %100  ;;  %v703_v33 = vpop.eup %702 }
 0x104   :  { %704 = vlog2.f32 %v101_v26  ;;  %v113_v42 = vmul.f32 0.6931472, %v703_v33 }
 0x105   :  { %v1005_v18 = vsub.f32 %v925_v27, %v109_v17  ;;  %v1008_v19 = vsub.f32 %v927_v28, %v109_v17  ;;  %706 = vpow2.f32 %v144_v22  ;;  %v107_v27 = vpop.xlane.xlu1 %106 }
 0x106   :  { %708 = vpow2.f32 %v146_v29  ;;  %v1027_v52 = vsub.f32 %v921_v24, %v113_v42  ;;  %v1030_v53 = vsub.f32 %v923_v25, %v113_v42 }
 0x107   :  { %v239_v39 = vmul.f32 %v639_v32, %v1005_v18  ;;  %v240_v40 = vmul.f32 %v640_v21, %v1008_v19  ;;  %710 = vpow2.f32 %v152_v30 }
 0x108   :  { %712 = vpow2.f32 %v154_v36 }
 0x109   :  { %v247_v41 = vadd.f32 %v240_v40, %v239_v39  ;;  %714 = vlog2.f32 %v107_v27  ;;  %v649_v39 = vsel %vm229_vm11, 1.0, %v795_v31 }
 0x10a   :  { %v705_v28 = vpop.eup %704  ;;  %v287_v16 = vsel %vm267_vm10, %v649_v39, 0.0 }
 0x10b   :  { %v111_v43 = vmul.f32 0.6931472, %v705_v28  ;;  %248 = vadd.xlane.f32.xlu1 %v247_v41  ;;  %v196_v44 = vpop.permute.xlu2 %195  ;;  %v707_v46 = vpop.eup %706  ;;  %v289_v28 = vsel %vm267_vm10, %v650_v57, 0.0 }
 0x10c   :  { %vm205_vm2 = vcmp.eq.s32.totalorder %v983_v8, %v196_v44  ;;  %vm206_vm3 = vcmp.eq.s32.totalorder %v989_v12, %v196_v44  ;;  %v199_v45 = vpop.permute.xlu0 %198  ;;  %v709_v51 = vpop.eup %708 }
 0x10d   :  { %v1019_v47 = vsub.f32 %v937_v37, %v111_v43  ;;  %v1022_v48 = vsub.f32 %v939_v38, %v111_v43  ;;  %v641_v49 = vsel %vm205_vm2, 1.0, %v795_v31  ;;  %v642_v50 = vsel %vm206_vm3, 1.0, %v795_v31  ;;  %v711_v61 = vpop.eup %710 }
 0x10e   :  { %vm207_vm4 = vcmp.eq.s32.totalorder %v983_v8, %v199_v45  ;;  %vm208_vm5 = vcmp.eq.s32.totalorder %v989_v12, %v199_v45  ;;  %v713_v1 = vpop.eup %712  ;;  %v160_v25 = vadd.f32 %v709_v51, %v707_v46 }
 0x10f   :  { %v643_v37 = vsel %vm207_vm4, 1.0, %v795_v31  ;;  %v644_v38 = vsel %vm208_vm5, 1.0, %v795_v31  ;;  %v241_v54 = vmul.f32 %v641_v49, %v1019_v47  ;;  %v242_v58 = vmul.f32 %v642_v50, %v1022_v48  ;;  %v715_v3 = vpop.eup %714 }
 0x110   :  { %v243_v62 = vmul.f32 %v643_v37, %v1027_v52  ;;  %v244_v24 = vmul.f32 %v644_v38, %v1030_v53  ;;  %v115_v5 = vmul.f32 0.6931472, %v715_v3  ;;  %v166_v6 = vadd.f32 %v713_v1, %v711_v61 }
 0x111   :  { %v250_v2 = vadd.f32 %v242_v58, %v241_v54 }
 0x112   :  { %v253_v4 = vadd.f32 %v244_v24, %v243_v62  ;;  %v1041_v9 = vsub.f32 %v933_v34, %v115_v5  ;;  %v1044_v10 = vsub.f32 %v935_v35, %v115_v5 }
 0x113   :  { %161 = vadd.xlane.f32.xlu1 %v160_v25  ;;  %251 = vadd.xlane.f32.xlu0 %v250_v2 }
 0x114   :  { %254 = vadd.xlane.f32.xlu2 %v253_v4 }
 0x119   :  { %v202_v7 = vpop.permute.xlu1 %201 }
 0x11a   :  { %vm209_vm6 = vcmp.eq.s32.totalorder %v983_v8, %v202_v7  ;;  %vm210_vm7 = vcmp.eq.s32.totalorder %v989_v12, %v202_v7 }
 0x11b   :  { %v645_v13 = vsel %vm209_vm6, 1.0, %v795_v31  ;;  %v646_v15 = vsel %vm210_vm7, 1.0, %v795_v31  ;;  %167 = vadd.xlane.f32.xlu1 %v166_v6 }
 0x11c   :  { %v245_v22 = vmul.f32 %v645_v13, %v1041_v9  ;;  %v246_v17 = vmul.f32 %v646_v15, %v1044_v10 }
 0x11e   :  { %v256_v26 = vadd.f32 %v246_v17, %v245_v22 }
 0x120   :  { %257 = vadd.xlane.f32.xlu2 %v256_v26 }
 0x144   :  { %v135_v34 = vpop.xlane.xlu2 %134 }
 0x145   :  { %v1053_v29 = vsub.f32 %v974_v63, %v135_v34  ;;  %v1056_v35 = vsub.f32 %v979_v0, %v135_v34  ;;  %v647_v63 = vsel %vm227_vm8, 1.0, %v795_v31  ;;  %v648_v0 = vsel %vm228_vm9, 1.0, %v795_v31 }
 0x146   :  { %v284_v33 = vsel %vm267_vm10, %v647_v63, 0.0  ;;  %v285_v36 = vsel %vm267_vm10, %v648_v0, 0.0 }
 0x147   :  { %v156_v8 = vmul.f32 1.442695, %v1053_v29  ;;  %v158_v12 = vmul.f32 1.442695, %v1056_v35  ;;  %v286_v40 = vadd.f32 %v285_v36, %v284_v33 }
 0x149   :  { %716 = vpow2.f32 %v156_v8  ;;  %v288_v41 = vadd.f32 %v287_v16, %v286_v40 }
 0x14a   :  { %718 = vpow2.f32 %v158_v12 }
 0x14b   :  { %v290_v42 = vadd.f32 %v289_v28, %v288_v41 }
 0x14c   :  { %v165_v27 = vpop.xlane.xlu2 %164 }
 0x14d   :  { %720 = vlog2.f32 %v165_v27 }
 0x14f   :  { %v717_v30 = vpop.eup %716 }
 0x150   :  { %v719_v32 = vpop.eup %718 }
 0x151   :  { %v169_v21 = vadd.f32 %v719_v32, %v717_v30 }
 0x153   :  { %170 = vadd.xlane.f32.xlu2 %v169_v21  ;;  %v721_v43 = vpop.eup %720 }
 0x154   :  { %v175_v45 = vmul.f32 0.6931472, %v721_v43 }
 0x156   :  { %v182_v31 = vsub.f32 %v964_v59, %v175_v45  ;;  %v183_v58 = vsub.f32 %v967_v60, %v175_v45 }
 0x158   :  { %v324_v2 = vmul.f32 1.442695, %v182_v31  ;;  %v326_v6 = vmul.f32 1.442695, %v183_v58  ;;  %v338_v16 = vsub.f32 %v182_v31, %v1019_v47 }
 0x15b   :  { %291 = vadd.xlane.f32.xlu2 %v290_v42 }
 0x17e   :  { %v249_v55 = vpop.xlane.xlu1 %248 }
 0x17f   :  { %v259_v44 = vsub.f32 0.0, %v249_v55 }
 0x181   :  { %v263_v49 = vmul.f32 %v647_v63, %v259_v44 }
 0x183   :  { %v268_v61 = vsel %vm267_vm10, %v263_v49, 0.0 }
 0x186   :  { %v162_v46 = vpop.xlane.xlu1 %161  ;;  %v252_v56 = vpop.xlane.xlu0 %251 }
 0x187   :  { %722 = vlog2.f32 %v162_v46  ;;  %v260_v50 = vsub.f32 0.0, %v252_v56  ;;  %v255_v51 = vpop.xlane.xlu2 %254 }
 0x188   :  { %v261_v37 = vsub.f32 0.0, %v255_v51 }
 0x189   :  { %v264_v38 = vmul.f32 %v648_v0, %v260_v50 }
 0x18a   :  { %v265_v54 = vmul.f32 %v649_v39, %v261_v37 }
 0x18b   :  { %v269_v62 = vsel %vm267_vm10, %v264_v38, 0.0 }
 0x18c   :  { %v270_v24 = vadd.f32 %v269_v62, %v268_v61  ;;  %v271_v1 = vsel %vm267_vm10, %v265_v54, 0.0 }
 0x18d   :  { %v723_v25 = vpop.eup %722 }
 0x18e   :  { %v173_v3 = vmul.f32 0.6931472, %v723_v25  ;;  %v168_v4 = vpop.xlane.xlu1 %167  ;;  %v272_v5 = vadd.f32 %v271_v1, %v270_v24 }
 0x18f   :  { %724 = vlog2.f32 %v168_v4 }
 0x190   :  { %v180_v7 = vsub.f32 %v986_v11, %v173_v3  ;;  %v181_v59 = vsub.f32 %v992_v14, %v173_v3  ;;  %726 = vpow2.f32 %v324_v2 }
 0x191   :  { %728 = vpow2.f32 %v326_v6 }
 0x192   :  { %v320_v60 = vmul.f32 1.442695, %v180_v7  ;;  %v322_v13 = vmul.f32 1.442695, %v181_v59  ;;  %v336_v21 = vsub.f32 %v180_v7, %v1005_v18  ;;  %v337_v36 = vsub.f32 %v181_v59, %v1008_v19  ;;  %v57_v59 = vld [vmem:[%s1183_s3 + $0x8] sm:$0xff] }
 0x193   :  { %v258_v15 = vpop.xlane.xlu2 %257 }
 0x194   :  { %730 = vpow2.f32 %v320_v60  ;;  %v262_v22 = vsub.f32 0.0, %v258_v15 }
 0x195   :  { %v725_v17 = vpop.eup %724  ;;  %732 = vpow2.f32 %v322_v13  ;;  %v385_v13 = vsel %vm267_vm10, %v57_v59, 0.0 }
 0x196   :  { %v177_v26 = vmul.f32 0.6931472, %v725_v17  ;;  %v266_v34 = vmul.f32 %v650_v57, %v262_v22  ;;  %v727_v8 = vpop.eup %726  ;;  %v58_v22 = vld [vmem:[%s1183_s3 + $0x10] sm:$0xff] }
 0x197   :  { %v729_v32 = vpop.eup %728  ;;  %v346_v27 = vmul.f32 %v727_v8, %v338_v16  ;;  %v387_v17 = vsel %vm267_vm10, %v58_v22, 0.0  ;;  %v484_v16 = vld [vmem:[%s1186_s6] sm:$0x1f] }
 0x198   :  { %v184_v12 = vsub.f32 %v995_v20, %v177_v26  ;;  %v185_v30 = vsub.f32 %v1000_v23, %v177_v26  ;;  %v273_v11 = vsel %vm267_vm10, %v266_v34, 0.0  ;;  %v339_v20 = vsub.f32 %v183_v58, %v1022_v48  ;;  %v1107_v26 = vld [vmem:[%s1183_s3 + $0x18] sm:$0xff] }
 0x199   :  { %v274_v14 = vadd.f32 %v273_v11, %v272_v5  ;;  %v389_v8 = vsel %vm267_vm10, %v1107_v26, 0.0 }
 0x19a   :  { %v731_v63 = vpop.eup %730  ;;  %v328_v0 = vmul.f32 1.442695, %v184_v12  ;;  %v330_v33 = vmul.f32 1.442695, %v185_v30  ;;  %v347_v57 = vmul.f32 %v729_v32, %v339_v20  ;;  %v340_v28 = vsub.f32 %v184_v12, %v1027_v52  ;;  %v556_v32 = vld [vmem:[%s1189_s9] sm:$0xff] }
 0x19b   :  { %v733_v39 = vpop.eup %732  ;;  %275 = vadd.xlane.f32.xlu1 %v274_v14  ;;  %v344_v40 = vmul.f32 %v731_v63, %v336_v21  ;;  %v341_v19 = vsub.f32 %v185_v30, %v1030_v53  ;;  %v486_v30 = vld [vmem:[%s1187_s7] sm:$0x1f]  ;;  %v557_v63 = vmul.f32 20.0, %v556_v32 }
 0x19c   :  { %734 = vpow2.f32 %v328_v0  ;;  %v345_v23 = vmul.f32 %v733_v39, %v337_v36  ;;  %v355_v18 = vadd.f32 %v347_v57, %v346_v27  ;;  %v487_v11 = vmul.f32 20.0, %v486_v30  ;;  %v422_v14 = vld [vmem:[%s1185_s5] sm:$0xff] }
 0x19d   :  { %736 = vpow2.f32 %v330_v33  ;;  %v423_v0 = vmul.f32 20.0, %v422_v14  ;;  %v565_v36 = vrot.slane %v557_v63, 4  ;;  %v485_v27 = vmul.f32 20.0, %v484_v16 }
 0x19e   :  { %v352_v41 = vadd.f32 %v345_v23, %v344_v40  ;;  %v497_v21 = vsel %vm488_vm13, %v487_v11, -inf }
 0x19f   :  { %v498_v33 = vrot.slane %v497_v21, 4  ;;  %v431_v39 = vrot.slane %v423_v0, 4  ;;  %v566_v20 = vmax.f32 %v557_v63, %v565_v36 }
 0x1a0   :  { %353 = vadd.xlane.f32.xlu0 %v352_v41  ;;  %v554_v41 = vld [vmem:[%s1188_s8] sm:$0xff]  ;;  %s796_s8 = smov 1.0  }
 0x1a1   :  { %v499_v40 = vmax.f32 %v497_v21, %v498_v33  ;;  %v432_v23 = vmax.f32 %v423_v0, %v431_v39 }
 0x1a2   :  { %v735_v42 = vpop.eup %734 }
 0x1a3   :  { %v737_v55 = vpop.eup %736  ;;  %356 = vadd.xlane.f32.xlu1 %v355_v18  ;;  %v348_v43 = vmul.f32 %v735_v42, %v340_v28  ;;  %v500_v57 = vrot.slane %v499_v40, 2  ;;  %v567_v18 = vrot.slane %v566_v20, 2  ;;  %v420_v28 = vld [vmem:[%s1184_s4] sm:$0xff]  ;;  %v433_v42 = vrot.slane %v432_v23, 2 }
 0x1a4   :  { %v349_v44 = vmul.f32 %v737_v55, %v341_v19  ;;  %v489_v19 = vsel %vm488_vm13, %v485_v27, -inf }
 0x1a5   :  { %v501_v55 = vmax.f32 %v499_v40, %v500_v57 }
 0x1a6   :  { %v358_v47 = vadd.f32 %v349_v44, %v348_v43  ;;  %v555_v43 = vmul.f32 20.0, %v554_v41  ;;  %v421_v44 = vmul.f32 20.0, %v420_v28 }
 0x1a8   :  { %359 = vadd.xlane.f32.xlu2 %v358_v47  ;;  %v490_v47 = vrot.slane %v489_v19, 4 }
 0x1c6   :  { %v171_v48 = vpop.xlane.xlu2 %170 }
 0x1c7   :  { %738 = vlog2.f32 %v171_v48  ;;  %v568_v48 = vmax.f32 %v566_v20, %v567_v18 }
 0x1cd   :  { %v739_v45 = vpop.eup %738 }
 0x1ce   :  { %v179_v46 = vmul.f32 0.6931472, %v739_v45  ;;  %v292_v61 = vpop.xlane.xlu2 %291  ;;  %v434_v45 = vmax.f32 %v432_v23, %v433_v42 }
 0x1cf   :  { %v293_v62 = vrot.slane %v292_v61, 4 }
 0x1d0   :  { %v186_v56 = vsub.f32 %v1053_v29, %v179_v46  ;;  %v187_v49 = vsub.f32 %v1056_v35, %v179_v46  ;;  %v502_v46 = vrot.slane %v501_v55, 1 }
 0x1d1   :  { %v294_v24 = vadd.f32 %v293_v62, %v292_v61 }
 0x1d2   :  { %v332_v50 = vmul.f32 1.442695, %v186_v56  ;;  %v334_v51 = vmul.f32 1.442695, %v187_v49  ;;  %v342_v52 = vsub.f32 %v186_v56, %v1041_v9  ;;  %v343_v37 = vsub.f32 %v187_v49, %v1044_v10  ;;  %v56_v10 = vld [vmem:[%s1183_s3] sm:$0xff] }
 0x1d3   :  { %v295_v29 = vrot.slane %v294_v24, 2  ;;  %v384_v60 = vsel %vm267_vm10, %v56_v10, 0.0  ;;  %v558_v49 = vrot.slane %v555_v43, 4 }
 0x1d4   :  { %740 = vpow2.f32 %v332_v50  ;;  %v386_v15 = vadd.f32 %v385_v13, %v384_v60  ;;  %v424_v50 = vrot.slane %v421_v44, 4 }
 0x1d5   :  { %742 = vpow2.f32 %v334_v51  ;;  %v296_v25 = vadd.f32 %v295_v29, %v294_v24  ;;  %v491_v51 = vmax.f32 %v489_v19, %v490_v47 }
 0x1d6   :  { %v388_v34 = vadd.f32 %v387_v17, %v386_v15 }
 0x1d7   :  { %v297_v4 = vrot.slane %v296_v25, 1 }
 0x1d8   :  { %v390_v12 = vadd.f32 %v389_v8, %v388_v34 }
 0x1d9   :  { %v298_v6 = vadd.f32 %v297_v4, %v296_v25 }
 0x1da   :  { %v741_v53 = vpop.eup %740  ;;  %391 = vadd.xlane.f32.xlu2 %v390_v12 }
 0x1db   :  { %v743_v38 = vpop.eup %742  ;;  %v350_v31 = vmul.f32 %v741_v53, %v342_v52  ;;  %v569_v52 = vrot.slane %v568_v48, 1  ;;  %v435_v53 = vrot.slane %v434_v45, 1 }
 0x1dc   :  { %v351_v54 = vmul.f32 %v743_v38, %v343_v37  ;;  %v503_v37 = vmax.f32 %v501_v55, %v502_v46 }
 0x1dd   :  { %v570_v24 = vmax.f32 %v568_v48, %v569_v52  ;;  %v436_v29 = vmax.f32 %v434_v45, %v435_v53 }
 0x1de   :  { %v361_v58 = vadd.f32 %v351_v54, %v350_v31  ;;  %v559_v31 = vmax.f32 %v555_v43, %v558_v49  ;;  %v425_v54 = vmax.f32 %v421_v44, %v424_v50 }
 0x1df   :  { %v1133_v4 = vsub.f32 %v557_v63, %v570_v24 }
 0x1e0   :  { %362 = vadd.xlane.f32.xlu0 %v361_v58  ;;  %v492_v58 = vrot.slane %v491_v51, 2  ;;  %v426_v25 = vrot.slane %v425_v54, 2 }
 0x1e1   :  { %v583_v15 = vmul.f32 1.442695, %v1133_v4 }
 0x20e   :  { %v276_v1 = vpop.xlane.xlu1 %275 }
 0x20f   :  { %v277_v35 = vrot.slane %v276_v1, 4 }
 0x211   :  { %v278_v2 = vadd.f32 %v277_v35, %v276_v1  ;;  %v1131_v1 = vsub.f32 %v487_v11, %v503_v37  ;;  %v560_v35 = vrot.slane %v559_v31, 2 }
 0x213   :  { %v279_v3 = vrot.slane %v278_v2, 2  ;;  %v354_v38 = vpop.xlane.xlu0 %353 }
 0x215   :  { %v280_v5 = vadd.f32 %v279_v3, %v278_v2  ;;  %v493_v2 = vmax.f32 %v491_v51, %v492_v58  ;;  %v364_v3 = vmul.f32 %v354_v38, %v56_v10 }
 0x216   :  { %v357_v56 = vpop.xlane.xlu1 %356 }
 0x217   :  { %v281_v9 = vrot.slane %v280_v5, 1  ;;  %v365_v61 = vmul.f32 %v357_v56, %v57_v59  ;;  %v427_v59 = vmax.f32 %v425_v54, %v426_v25  ;;  %v494_v60 = vrot.slane %v493_v2, 1 }
 0x219   :  { %v282_v7 = vadd.f32 %v281_v9, %v280_v5  ;;  %v1135_v5 = vsub.f32 %v423_v0, %v436_v29  ;;  %v517_v9 = vmul.f32 1.442695, %v1131_v1  ;;  %v369_v13 = vsel %vm267_vm10, %v365_v61, 0.0 }
 0x21a   :  { %v428_v34 = vrot.slane %v427_v59, 1  ;;  %v495_v8 = vmax.f32 %v493_v2, %v494_v60 }
 0x21b   :  { %651 = vpush %v282_v7  ;;  %v360_v62 = vpop.xlane.xlu2 %359  ;;  %v561_v7 = vmax.f32 %v559_v31, %v560_v35  ;;  %v449_v17 = vmul.f32 1.442695, %v1135_v5  ;;  %744 = vpow2.f32 %v517_v9 }
 0x21c   :  { %653 = vpush %v298_v6  ;;  %v366_v6 = vmul.f32 %v360_v62, %v58_v22  ;;  %v368_v22 = vsel %vm267_vm10, %v364_v3, 0.0  ;;  %746 = vpow2.f32 %v583_v15  ;;  %v429_v14 = vmax.f32 %v427_v59, %v428_v34 }
 0x21d   :  { %v562_v10 = vrot.slane %v561_v7, 1  ;;  %v370_v30 = vadd.f32 %v369_v13, %v368_v22  ;;  %v1146_v21 = vsub.f32 %v485_v27, %v495_v8 }
 0x21e   :  { %v371_v11 = vsel %vm267_vm10, %v366_v6, 0.0  ;;  %v1150_v36 = vsub.f32 %v421_v44, %v429_v14 }
 0x21f   :  { %v563_v32 = vmax.f32 %v561_v7, %v562_v10  ;;  %v505_v39 = vmul.f32 1.442695, %v1146_v21  ;;  %v372_v16 = vadd.f32 %v371_v11, %v370_v30 }
 0x220   :  { %v438_v41 = vmul.f32 1.442695, %v1150_v36 }
 0x221   :  { %v745_v63 = vpop.eup %744  ;;  %v1148_v33 = vsub.f32 %v555_v43, %v563_v32 }
 0x222   :  { %v519_v20 = vsel %vm488_vm13, %v745_v63, 0.0  ;;  %v747_v23 = vpop.eup %746 }
 0x223   :  { %v572_v57 = vmul.f32 1.442695, %v1148_v33  ;;  %v520_v27 = vrot.slane %v519_v20, 4  ;;  %v585_v42 = vrot.slane %v747_v23, 4 }
 0x225   :  { %v521_v48 = vadd.f32 %v520_v27, %v519_v20 }
 0x227   :  { %v522_v50 = vrot.slane %v521_v48, 2 }
 0x229   :  { %v523_v58 = vadd.f32 %v522_v50, %v521_v48 }
 0x22b   :  { %v524_v3 = vrot.slane %v523_v58, 1 }
 0x22d   :  { %v525_v34 = vadd.f32 %v524_v3, %v523_v58 }
 0x24c   :  { %s1138_s4 = spop %651 }
 0x24d   :  { %s654_s6 = spop %653 }
 0x24e   :  { %s300_s25 = smax.f32 %s796_s8, %s654_s6 }
 0x24f   :  { %v301_v12 = vstv %s300_s25 }
 0x250   :  { %748 = vrcp.f32 %v301_v12  ;;  %v313_v44 = vand.u32 2147483648, %v301_v12  ;;  %vm307_vm14 = vweird.f32 %v301_v12  ;;  %v311_v46 = vand.u32 2147483647, %v301_v12 }
 0x251   :  { %750 = vpow2.f32 %v449_v17 }
 0x252   :  { %752 = vpow2.f32 %v505_v39  ;;  %v314_v53 = vor.u32 1.1754944e-38, %v313_v44  ;;  %vm312_vm1 = vcmp.eq.f32.partialorder %v311_v46, 8.507059e+37 }
 0x253   :  { %v363_v0 = vpop.xlane.xlu0 %362  ;;  %754 = vpow2.f32 %v572_v57 }
 0x254   :  { %v367_v40 = vmul.f32 %v363_v0, %v1107_v26  ;;  %v586_v26 = vadd.f32 %v747_v23, %v585_v42  ;;  %756 = vpow2.f32 %v438_v41 }
 0x256   :  { %v749_v18 = vpop.eup %748  ;;  %v373_v28 = vsel %vm267_vm10, %v367_v40, 0.0  ;;  %v587_v56 = vrot.slane %v586_v26, 2 }
 0x257   :  { %v751_v19 = vpop.eup %750  ;;  %v303_v55 = vmul.f32 %v749_v18, %v301_v12  ;;  %v374_v43 = vadd.f32 %v373_v28, %v372_v16  ;;  %vm308_vm15 = vweird.f32 %v749_v18 }
 0x258   :  { %v451_v47 = vrot.slane %v751_v19, 4  ;;  %v753_v51 = vpop.eup %752  ;;  %vm1158_vm0 = vmor %vm307_vm14, %vm308_vm15  ;;  %v588_v38 = vadd.f32 %v587_v56, %v586_v26 }
 0x259   :  { %v304_v45 = vsub.f32 1.0, %v303_v55  ;;  %375 = vadd.xlane.f32.xlu1 %v374_v43  ;;  %v507_v54 = vsel %vm488_vm13, %v753_v51, 0.0  ;;  %v755_v61 = vpop.eup %754 }
 0x25a   :  { %v452_v49 = vadd.f32 %v751_v19, %v451_v47  ;;  %v508_v24 = vrot.slane %v507_v54, 4  ;;  %v757_v29 = vpop.eup %756  ;;  %v574_v35 = vrot.slane %v755_v61, 4  ;;  %v589_v25 = vrot.slane %v588_v38, 1 }
 0x25b   :  { %v305_v52 = vmul.f32 %v749_v18, %v304_v45  ;;  %v440_v6 = vrot.slane %v757_v29, 4 }
 0x25c   :  { %v453_v31 = vrot.slane %v452_v49, 2  ;;  %v509_v7 = vadd.f32 %v508_v24, %v507_v54  ;;  %v575_v60 = vadd.f32 %v755_v61, %v574_v35  ;;  %v590_v13 = vadd.f32 %v589_v25, %v588_v38 }
 0x25d   :  { %v306_v62 = vadd.f32 %v749_v18, %v305_v52  ;;  %v441_v17 = vadd.f32 %v757_v29, %v440_v6 }
 0x25e   :  { %v454_v2 = vadd.f32 %v453_v31, %v452_v49  ;;  %v510_v10 = vrot.slane %v509_v7, 2  ;;  %v576_v8 = vrot.slane %v575_v60, 2  ;;  %758 = vlog2.f32 %v590_v13 }
 0x25f   :  { %v310_v9 = vsel %vm1158_vm0, %v749_v18, %v306_v62  ;;  %v442_v12 = vrot.slane %v441_v17, 2  ;;  %760 = vlog2.f32 %v525_v34 }
 0x260   :  { %v315_v59 = vsel %vm312_vm1, %v314_v53, %v310_v9  ;;  %v455_v15 = vrot.slane %v454_v2, 1  ;;  %v511_v30 = vadd.f32 %v510_v10, %v509_v7  ;;  %v577_v11 = vadd.f32 %v576_v8, %v575_v60 }
 0x261   :  { %655 = vpush %v315_v59  ;;  %v443_v32 = vadd.f32 %v442_v12, %v441_v17  ;;  %v798_v59 = vmov 128.0  }
 0x262   :  { %v456_v22 = vadd.f32 %v455_v15, %v454_v2  ;;  %v512_v14 = vrot.slane %v511_v30, 1  ;;  %v578_v63 = vrot.slane %v577_v11, 1 }
 0x263   :  { %v444_v0 = vrot.slane %v443_v32, 1 }
 0x264   :  { %762 = vlog2.f32 %v456_v22  ;;  %v513_v39 = vadd.f32 %v512_v14, %v511_v30  ;;  %v759_v40 = vpop.eup %758  ;;  %v579_v16 = vadd.f32 %v578_v63, %v577_v11 }
 0x265   :  { %v761_v20 = vpop.eup %760  ;;  %v592_v23 = vmul.f32 0.6931472, %v759_v40  ;;  %v445_v57 = vadd.f32 %v444_v0, %v443_v32 }
 0x266   :  { %764 = vlog2.f32 %v513_v39  ;;  %v527_v27 = vmul.f32 0.6931472, %v761_v20 }
 0x267   :  { %766 = vlog2.f32 %v579_v16  ;;  %v593_v18 = vsub.f32 %v1133_v4, %v592_v23 }
 0x268   :  { %768 = vlog2.f32 %v445_v57  ;;  %v528_v42 = vsub.f32 %v1131_v1, %v527_v27 }
 0x269   :  { %v594_v19 = vmul.f32 1.442695, %v593_v18 }
 0x26a   :  { %v763_v41 = vpop.eup %762  ;;  %v529_v43 = vmul.f32 1.442695, %v528_v42 }
 0x26b   :  { %v458_v28 = vmul.f32 0.6931472, %v763_v41  ;;  %770 = vpow2.f32 %v594_v19 }
 0x26c   :  { %v765_v44 = vpop.eup %764  ;;  %772 = vpow2.f32 %v529_v43 }
 0x26d   :  { %v459_v55 = vsub.f32 %v1135_v5, %v458_v28  ;;  %v767_v47 = vpop.eup %766  ;;  %v515_v48 = vmul.f32 0.6931472, %v765_v44 }
 0x26e   :  { %v769_v45 = vpop.eup %768  ;;  %v581_v46 = vmul.f32 0.6931472, %v767_v47 }
 0x26f   :  { %v460_v26 = vmul.f32 1.442695, %v459_v55  ;;  %v447_v56 = vmul.f32 0.6931472, %v769_v45  ;;  %v516_v4 = vsub.f32 %v1146_v21, %v515_v48  ;;  %v392_v21 = vpop.xlane.xlu2 %391 }
 0x270   :  { %v582_v49 = vsub.f32 %v1148_v33, %v581_v46  ;;  %v393_v33 = vrot.slane %v392_v21, 4 }
 0x271   :  { %774 = vpow2.f32 %v460_v26  ;;  %v448_v1 = vsub.f32 %v1150_v36, %v447_v56  ;;  %v531_v50 = vsub.f32 %v528_v42, %v516_v4  ;;  %v771_v5 = vpop.eup %770 }
 0x272   :  { %v596_v51 = vsub.f32 %v593_v18, %v582_v49  ;;  %v773_v52 = vpop.eup %772  ;;  %v394_v36 = vadd.f32 %v393_v33, %v392_v21  ;;  %776 = vrcp.f32 %v798_v59 }
 0x273   :  { %v462_v53 = vsub.f32 %v459_v55, %v448_v1  ;;  %v532_v31 = vmul.f32 %v773_v52, %v531_v50 }
 0x274   :  { %v597_v38 = vmul.f32 %v771_v5, %v596_v51  ;;  %v395_v61 = vrot.slane %v394_v36, 2 }
 0x275   :  { %v533_v58 = vsel %vm488_vm13, %v532_v31, 0.0 }
 0x276   :  { %598 = vadd.xlane.f32.xlu2 %v597_v38  ;;  %534 = vadd.xlane.f32.xlu1 %v533_v58  ;;  %v396_v35 = vadd.f32 %v395_v61, %v394_v36 }
 0x277   :  { %v775_v37 = vpop.eup %774 }
 0x278   :  { %v463_v54 = vmul.f32 %v775_v37, %v462_v53  ;;  %v397_v3 = vrot.slane %v396_v35, 1  ;;  %v777_v10 = vpop.eup %776 }
 0x279   :  { %v474_v30 = vmul.f32 128.0, %v777_v10  ;;  %vm478_vm4 = vweird.f32 %v777_v10 }
 0x27a   :  { %464 = vadd.xlane.f32.xlu0 %v463_v54  ;;  %v398_v7 = vadd.f32 %v397_v3, %v396_v35 }
 0x27b   :  { %v475_v63 = vsub.f32 1.0, %v474_v30 }
 0x27d   :  { %v476_v23 = vmul.f32 %v777_v10, %v475_v63 }
 0x27f   :  { %v477_v55 = vadd.f32 %v777_v10, %v476_v23 }
 0x281   :  { %v479_v56 = vsel %vm478_vm4, %v777_v10, %v477_v55 }
 0x292   :  { %s656_s26 = spop %655 }
 0x293   :  { %s317_s27 = smul.f32 %s656_s26, %s1138_s4 }
 0x295   :  { %319 = sst [smem:[#allocation2]] %s317_s27 }
 0x2cc   :  { %v376_v62 = vpop.xlane.xlu1 %375 }
 0x2cd   :  { %v377_v24 = vrot.slane %v376_v62, 4 }
 0x2cf   :  { %v378_v29 = vadd.f32 %v377_v24, %v376_v62 }
 0x2d1   :  { %v379_v25 = vrot.slane %v378_v29, 2 }
 0x2d3   :  { %v380_v2 = vadd.f32 %v379_v25, %v378_v29 }
 0x2d5   :  { %v381_v9 = vrot.slane %v380_v2, 1 }
 0x2d7   :  { %v382_v6 = vadd.f32 %v381_v9, %v380_v2 }
 0x2d9   :  { %657 = vpush %v382_v6 }
 0x2da   :  { %659 = vpush %v398_v7 }
 0x2e9   :  { %v535_v13 = vpop.xlane.xlu1 %534  ;;  %v599_v15 = vpop.xlane.xlu2 %598 }
 0x2ea   :  { %v536_v34 = vrot.slane %v535_v13, 4  ;;  %v600_v22 = vrot.slane %v599_v15, 4 }
 0x2ec   :  { %v537_v11 = vadd.f32 %v536_v34, %v535_v13  ;;  %v601_v32 = vadd.f32 %v600_v22, %v599_v15 }
 0x2ed   :  { %v465_v60 = vpop.xlane.xlu0 %464 }
 0x2ee   :  { %v466_v17 = vrot.slane %v465_v60, 4  ;;  %v538_v39 = vrot.slane %v537_v11, 2  ;;  %v602_v16 = vrot.slane %v601_v32, 2 }
 0x2f0   :  { %v467_v12 = vadd.f32 %v466_v17, %v465_v60  ;;  %v539_v41 = vadd.f32 %v538_v39, %v537_v11  ;;  %v603_v18 = vadd.f32 %v602_v16, %v601_v32 }
 0x2f2   :  { %v468_v14 = vrot.slane %v467_v12, 2  ;;  %v540_v26 = vrot.slane %v539_v41, 1  ;;  %v604_v48 = vrot.slane %v603_v18, 1 }
 0x2f4   :  { %v469_v20 = vadd.f32 %v468_v14, %v467_v12  ;;  %v541_v4 = vadd.f32 %v540_v26, %v539_v41  ;;  %v605_v49 = vadd.f32 %v604_v48, %v603_v18 }
 0x2f6   :  { %v470_v19 = vrot.slane %v469_v20, 1 }
 0x2f8   :  { %v471_v46 = vadd.f32 %v470_v19, %v469_v20 }
 0x30a   :  { %s1173_s29 = spop %657 }
 0x30b   :  { %s660_s2 = spop %659 }
 0x30c   :  { %s400_s30 = smax.f32 %s796_s8, %s660_s2 }
 0x30d   :  { %v401_v8 = vstv %s400_s30 }
 0x30e   :  { %778 = vrcp.f32 %v401_v8  ;;  %v413_v27 = vand.u32 2147483648, %v401_v8  ;;  %v411_v42 = vand.u32 2147483647, %v401_v8  ;;  %vm407_vm3 = vweird.f32 %v401_v8 }
 0x310   :  { %v414_v44 = vor.u32 1.1754944e-38, %v413_v27  ;;  %vm412_vm6 = vcmp.eq.f32.partialorder %v411_v42, 8.507059e+37 }
 0x314   :  { %v779_v0 = vpop.eup %778 }
 0x315   :  { %v403_v40 = vmul.f32 %v779_v0, %v401_v8  ;;  %vm408_vm2 = vweird.f32 %v779_v0 }
 0x316   :  { %vm409_vm5 = vmor %vm407_vm3, %vm408_vm2 }
 0x317   :  { %v404_v57 = vsub.f32 1.0, %v403_v40 }
 0x319   :  { %v405_v28 = vmul.f32 %v779_v0, %v404_v57 }
 0x31b   :  { %v406_v43 = vadd.f32 %v779_v0, %v405_v28 }
 0x31d   :  { %v410_v47 = vsel %vm409_vm5, %v779_v0, %v406_v43 }
 0x31e   :  { %v415_v45 = vsel %vm412_vm6, %v414_v44, %v410_v47 }
 0x31f   :  { %661 = vpush %v415_v45 }
 0x320   :  { %663 = vpush %v471_v46 }
 0x321   :  { %665 = vpush %v479_v56 }
 0x322   :  { %667 = vpush %v541_v4 }
 0x323   :  { %669 = vpush %v605_v49 }
 0x350   :  { %s662_s1 = spop %661 }
 0x351   :  { %s417_s0 = smul.f32 %s662_s1, %s1173_s29  ;;  %s664_s14 = spop %663 }
 0x352   :  { %s666_s15 = spop %665 }
 0x353   :  { %419 = sst [smem:[#allocation2 + $0x1]] %s417_s0  ;;  %s481_s16 = smul.f32 %s666_s15, %s664_s14 }
 0x354   :  { %s668_s17 = spop %667 }
 0x355   :  { %483 = sst [smem:[#allocation2 + $0x2]] %s481_s16  ;;  %s551_s18 = smul.f32 %s668_s17, %s666_s15 }
 0x356   :  { %s670_s19 = spop %669 }
 0x357   :  { %553 = sst [smem:[#allocation2 + $0x3]] %s551_s18  ;;  %s615_s20 = smul.f32 %s670_s19, %s666_s15 }
 0x359   :  { %617 = sst [smem:[#allocation2 + $0x4]] %s615_s20 }
 0x35a   :  { %632 = dma.smem_to_vmem %s799_s21, 16, %s630_s13, [#allocation3]  }
 0x35b   :  { %792 = dma.done.wait [#allocation3], 16  }
 0x35c   :  { %793 = vsyncadd [#allocation3], 4294967280 }
 0x35d   :  { %637 = sfence }
 0x35e   :  { %638 = vsyncpa [#allocation3], 1 }

</bundles_post_ra>
